<compile_context>
chip_gen: v5e
topology: v5e:2x2
jax: 0.10.0
libtpu: 0.0.40
codegen_flags: <defaults>
</compile_context>

<pallas_src>
import functools

import jax
import jax.numpy as jnp
from jax import lax
from jax.experimental import pallas as pl
from jax.experimental.pallas import tpu as pltpu


def _pick_row_tile(h, w, cin, cout, budget_bytes=4 << 20):
    """Largest divisor of `h` whose per-grid-step working set fits the budget
    (double-buffered input/output blocks + rough in-kernel temporaries)."""
    best = 1
    for th in range(1, h + 1):
        if h % th:
            continue
        x_blk = (th + 2) * w * cin * 4           # input rows (+ halo), f32
        o_blk = th * 2 * w * 2 * cout * 4        # interleaved output rows, f32
        tmp = 10 * th * w * max(cin, cout) * 4   # in-kernel temporaries (rough)
        if 2 * (x_blk + o_blk) + tmp <= budget_bytes:
            best = th
    return best


# ---------------------------------------------------------------------------
# Default branch: fused  1x1 conv + BN + act + bilinear x2 (align_corners=False)
# ---------------------------------------------------------------------------
def _conv1x1_bn_bilinear2x_kernel(x_ref, xu_ref, xd_ref, w_ref, s_ref, b_ref,
                                  o_ref, *, act):
    th, wd, cin = x_ref.shape[1], x_ref.shape[2], x_ref.shape[3]
    cout = w_ref.shape[1]

    # Rows of this block plus a 1-row halo on each side.  The halo rows are
    # delivered (edge-clamped) by the up/down index_maps -> no HBM edge pad.
    xa = jnp.concatenate([xu_ref[0], x_ref[0], xd_ref[0]], axis=0)  # (th+2,W,cin)

    # Fused 1x1 conv (bf16 MXU operands, f32 accumulation) + BN + activation.
    a = xa.reshape((th + 2) * wd, cin).astype(jnp.bfloat16)
    y = jnp.dot(a, w_ref[...].astype(jnp.bfloat16),
                preferred_element_type=jnp.float32)
    y = y * s_ref[...] + b_ref[...]
    if act == "relu":
        y = jnp.maximum(y, 0.0)
    # TODO(synk): only 'relu'/'none' act types are wired into the fused
    # epilogue (the module's default act_type is 'relu').
    y = y.reshape(th + 2, wd, cout)

    # Bilinear x2, align_corners=False.  Vertical mix (rows 2i / 2i+1):
    top, mid, bot = y[0:th], y[1:th + 1], y[2:th + 2]
    e_h = 0.75 * mid + 0.25 * top
    o_h = 0.75 * mid + 0.25 * bot

    def colmix(t):                       # columns 2j / 2j+1 (edge-clamped)
        lf = jnp.concatenate([t[:, :1], t[:, :-1]], axis=1)
        rt = jnp.concatenate([t[:, 1:], t[:, -1:]], axis=1)
        return 0.75 * t + 0.25 * lf, 0.75 * t + 0.25 * rt

    ee, eo = colmix(e_h)
    oe, oo = colmix(o_h)

    # Interleave-free output layout: block (1, th, 2, W, 2*cout) holds
    # out[2i+a, 2j+b, c] at [0, i, a, j, b*cout + c]  ->  the wrapper reshape
    # to (2H, 2W, cout) is contiguity-preserving (free).
    o_ref[0, :, 0, :, :] = jnp.concatenate([ee, eo], axis=-1).astype(o_ref.dtype)
    o_ref[0, :, 1, :, :] = jnp.concatenate([oe, oo], axis=-1).astype(o_ref.dtype)


def conv1x1_bn_act_bilinear_up2(x, w, scale, bias, act="relu", row_tile=None):
    """x: NHWC; w: (cout, cin, 1, 1) PyTorch Conv2d layout (bias=False)."""
    n, h, wd, cin = x.shape
    cout = w.shape[0]
    th = row_tile if row_tile is not None else _pick_row_tile(h, wd, cin, cout)
    assert h % th == 0, (h, th)
    nrb = h // th

    wmat = jnp.transpose(w.reshape(cout, cin), (1, 0))       # (cin, cout)
    s = scale.astype(jnp.float32).reshape(1, cout)
    b = bias.astype(jnp.float32).reshape(1, cout)

    out = pl.pallas_call(
        functools.partial(_conv1x1_bn_bilinear2x_kernel, act=act),
        out_shape=jax.ShapeDtypeStruct((n, h, 2, wd, 2 * cout), jnp.float32),
        grid=(n, nrb),
        in_specs=[
            pl.BlockSpec((1, th, wd, cin), lambda bi, ri: (bi, ri, 0, 0)),
            # 1-row halo above (edge-clamped at the top of the image)
            pl.BlockSpec((1, 1, wd, cin),
                         lambda bi, ri: (bi, jnp.maximum(ri * th - 1, 0), 0, 0)),
            # 1-row halo below (edge-clamped at the bottom of the image)
            pl.BlockSpec((1, 1, wd, cin),
                         lambda bi, ri: (bi, jnp.minimum((ri + 1) * th, h - 1), 0, 0)),
            pl.BlockSpec((cin, cout), lambda bi, ri: (0, 0)),
            pl.BlockSpec((1, cout), lambda bi, ri: (0, 0)),
            pl.BlockSpec((1, cout), lambda bi, ri: (0, 0)),
        ],
        out_specs=pl.BlockSpec((1, th, 2, wd, 2 * cout),
                               lambda bi, ri: (bi, ri, 0, 0, 0)),
        compiler_params=pltpu.CompilerParams(
            dimension_semantics=("parallel", "parallel")),
    )(x, x, x, wmat, s, b)
    # (n, h, 2, wd, 2*cout) has the same memory order as (n, 2h, 2wd, cout).
    return out.reshape(n, 2 * h, 2 * wd, cout)


# ---------------------------------------------------------------------------
# 'deconvolution' branch: fused ConvTranspose2d(3x3, stride 2, pad 1, out_pad 1)
# via sub-pixel phase decomposition (no structural-zero MXU work):
#   out[2m,  2q  ] = x[m,q]  w11
#   out[2m,  2q+1] = x[m,q]  w12 + x[m,q+1]  w10
#   out[2m+1,2q  ] = x[m,q]  w21 + x[m+1,q]  w01
#   out[2m+1,2q+1] = x[m,q]  w22 + x[m,q+1]  w20 + x[m+1,q] w02 + x[m+1,q+1] w00
# ---------------------------------------------------------------------------
def _deconv3x3_s2_kernel(x_ref, xd_ref, wa_ref, war_ref, wb_ref, wbr_ref, o_ref):
    th, wd, cin = x_ref.shape[1], x_ref.shape[2], x_ref.shape[3]
    cout = wbr_ref.shape[1]
    last = pl.program_id(1) == pl.num_programs(1) - 1

    # Row m+1 below this block: first row of the next block, or zeros at the
    # global bottom (transposed conv uses zero padding, not edge clamp).
    dn = jnp.where(last, 0.0, 1.0) * xd_ref[0]                # (1, W, cin)
    x = x_ref[0]                                              # (th, W, cin)
    x_ext = jnp.concatenate([x, dn], axis=0)                  # (th+1, W, cin)

    a_rows = x                                                # x[m, q]
    b_rows = x_ext[1:th + 1]                                  # x[m+1, q]
    zcol = jnp.zeros((th, 1, cin), x.dtype)
    a_r = jnp.concatenate([a_rows[:, 1:], zcol], axis=1)      # x[m,   q+1]
    b_r = jnp.concatenate([b_rows[:, 1:], zcol], axis=1)      # x[m+1, q+1]

    def mm(lhs, w_all):
        m = lhs.reshape(th * wd, cin).astype(jnp.bfloat16)
        return jnp.dot(m, w_all.astype(jnp.bfloat16),
                       preferred_element_type=jnp.float32)

    ya = mm(a_rows, wa_ref[...])     # [w11 | w12 | w21 | w22]
    yar = mm(a_r, war_ref[...])      # [w10 | w20]
    yb = mm(b_rows, wb_ref[...])     # [w01 | w02]
    ybr = mm(b_r, wbr_ref[...])      # w00

    ee = ya[:, 0 * cout:1 * cout]
    eo = ya[:, 1 * cout:2 * cout] + yar[:, 0:cout]
    oe = ya[:, 2 * cout:3 * cout] + yb[:, 0:cout]
    oo = (ya[:, 3 * cout:4 * cout] + yar[:, cout:2 * cout]
          + yb[:, cout:2 * cout] + ybr)

    def rs(t):
        return t.reshape(th, wd, cout)

    o_ref[0, :, 0, :, :] = jnp.concatenate([rs(ee), rs(eo)], axis=-1).astype(o_ref.dtype)
    o_ref[0, :, 1, :, :] = jnp.concatenate([rs(oe), rs(oo)], axis=-1).astype(o_ref.dtype)


def conv_transpose2d_3x3_s2(x, w, row_tile=None):
    """x: NHWC;  w: (cin, cout, 3, 3) PyTorch ConvTranspose2d layout (bias=False)."""
    n, h, wd, cin = x.shape
    cout = w.shape[1]
    th = row_tile if row_tile is not None else _pick_row_tile(h, wd, cin, cout)
    assert h % th == 0, (h, th)
    nrb = h // th

    tap = lambda a, b: w[:, :, a, b]                          # (cin, cout)
    w_a = jnp.concatenate([tap(1, 1), tap(1, 2), tap(2, 1), tap(2, 2)], axis=1)
    w_ar = jnp.concatenate([tap(1, 0), tap(2, 0)], axis=1)
    w_b = jnp.concatenate([tap(0, 1), tap(0, 2)], axis=1)
    w_br = tap(0, 0)

    out = pl.pallas_call(
        _deconv3x3_s2_kernel,
        out_shape=jax.ShapeDtypeStruct((n, h, 2, wd, 2 * cout), jnp.float32),
        grid=(n, nrb),
        in_specs=[
            pl.BlockSpec((1, th, wd, cin), lambda bi, ri: (bi, ri, 0, 0)),
            pl.BlockSpec((1, 1, wd, cin),
                         lambda bi, ri: (bi, jnp.minimum((ri + 1) * th, h - 1), 0, 0)),
            pl.BlockSpec((cin, 4 * cout), lambda bi, ri: (0, 0)),
            pl.BlockSpec((cin, 2 * cout), lambda bi, ri: (0, 0)),
            pl.BlockSpec((cin, 2 * cout), lambda bi, ri: (0, 0)),
            pl.BlockSpec((cin, cout), lambda bi, ri: (0, 0)),
        ],
        out_specs=pl.BlockSpec((1, th, 2, wd, 2 * cout),
                               lambda bi, ri: (bi, ri, 0, 0, 0)),
        compiler_params=pltpu.CompilerParams(
            dimension_semantics=("parallel", "parallel")),
    )(x, x, w_a, w_ar, w_b, w_br)
    return out.reshape(n, 2 * h, 2 * wd, cout)


# ---------------------------------------------------------------------------
# Public forwards (NCHW in / NCHW out, like PyTorch)
# ---------------------------------------------------------------------------
@functools.partial(jax.jit, static_argnames=("row_tile",))
def upsample_forward_bilinear(params, x_nchw, row_tile=None):
    """Upsample(in, out) default branch: ConvBNAct(1x1, relu) -> bilinear x2."""
    x = jnp.transpose(x_nchw, (0, 2, 3, 1)).astype(jnp.float32)
    y = conv1x1_bn_act_bilinear_up2(x, params["conv_w"], params["bn_scale"],
                                    params["bn_bias"], act="relu",
                                    row_tile=row_tile)
    return jnp.transpose(y, (0, 3, 1, 2))


@functools.partial(jax.jit, static_argnames=("row_tile",))
def upsample_forward_deconv(params, x_nchw, row_tile=None):
    """Upsample(in, out, upsample_type='deconvolution') branch."""
    x = jnp.transpose(x_nchw, (0, 2, 3, 1)).astype(jnp.float32)
    y = conv_transpose2d_3x3_s2(x, params["deconv_w"], row_tile=row_tile)
    return jnp.transpose(y, (0, 3, 1, 2))


# ---------------------------------------------------------------------------
# Deterministic synthetic parameters (BN folded to eval-mode scale/bias)
# ---------------------------------------------------------------------------
def build_params(key, in_channels, out_channels, upsample_type=None):
    k1, k2, k3, k4, k5 = jax.random.split(key, 5)
    if upsample_type == "deconvolution":
        fan_in = float(in_channels * 9)
        w = jax.random.normal(k1, (in_channels, out_channels, 3, 3),
                              jnp.float32) / jnp.sqrt(fan_in)
        return {"deconv_w": w}
    fan_in = float(in_channels)
    w = jax.random.normal(k1, (out_channels, in_channels, 1, 1),
                          jnp.float32) / jnp.sqrt(fan_in)
    gamma = 1.0 + 0.1 * jax.random.normal(k2, (out_channels,), jnp.float32)
    beta = 0.1 * jax.random.normal(k3, (out_channels,), jnp.float32)
    mean = 0.1 * jax.random.normal(k4, (out_channels,), jnp.float32)
    var = 1.0 + 0.1 * jnp.abs(jax.random.normal(k5, (out_channels,), jnp.float32))
    scale = gamma / jnp.sqrt(var + 1e-5)
    return {"conv_w": w, "bn_scale": scale, "bn_bias": beta - mean * scale}


# ---------------------------------------------------------------------------
# Plain-JAX references (used only for the self-check in __main__)
# ---------------------------------------------------------------------------
def _ref_bilinear_up2(x):
    def interp(arr, axis, size):
        out_idx = jnp.arange(2 * size)
        src = jnp.maximum((out_idx + 0.5) / 2.0 - 0.5, 0.0)
        i0 = jnp.minimum(jnp.floor(src).astype(jnp.int32), size - 1)
        i1 = jnp.minimum(i0 + 1, size - 1)
        w1 = src - i0.astype(jnp.float32)
        w0 = 1.0 - w1
        a0 = jnp.take(arr, i0, axis=axis)
        a1 = jnp.take(arr, i1, axis=axis)
        shape = [1] * arr.ndim
        shape[axis] = 2 * size
        return a0 * w0.reshape(shape) + a1 * w1.reshape(shape)

    _, h, w, _ = x.shape
    return interp(interp(x, 1, h), 2, w)


def _ref_forward_bilinear(params, x_nchw):
    x = jnp.transpose(x_nchw, (0, 2, 3, 1)).astype(jnp.float32)
    cout, cin = params["conv_w"].shape[:2]
    wmat = params["conv_w"].reshape(cout, cin).T
    y = jnp.einsum("nhwc,cd->nhwd", x, wmat, precision=lax.Precision.HIGHEST)
    y = jnp.maximum(y * params["bn_scale"] + params["bn_bias"], 0.0)
    y = _ref_bilinear_up2(y)
    return jnp.transpose(y, (0, 3, 1, 2))


def _ref_forward_deconv(params, x_nchw):
    x = jnp.transpose(x_nchw, (0, 2, 3, 1)).astype(jnp.float32)
    w = params["deconv_w"]                                   # (cin, cout, 3, 3)
    wf = jnp.transpose(jnp.flip(w, (2, 3)), (2, 3, 0, 1))    # HWIO
    y = lax.conv_general_dilated(
        x, wf, window_strides=(1, 1), padding=((1, 2), (1, 2)),
        lhs_dilation=(2, 2), dimension_numbers=("NHWC", "HWIO", "NHWC"),
        precision=lax.Precision.HIGHEST)
    return jnp.transpose(y, (0, 3, 1, 2))


if __name__ == "__main__":
    root = jax.random.PRNGKey(0)
    kx, kp1, kp2 = jax.random.split(root, 3)

    N, CIN, COUT, H, W = 2, 4, 8, 16, 16
    x = jax.random.normal(kx, (N, CIN, H, W), jnp.float32)   # NCHW like PyTorch

    # default branch: ConvBNAct(1x1, relu) + bilinear x2   (upsample_type=None)
    p_bil = build_params(kp1, CIN, COUT, upsample_type=None)
    ref_bil = _ref_forward_bilinear(p_bil, x)
    for rt in (None, 8):   # single-row-block path and multi-block halo path
        out_bil = jax.block_until_ready(upsample_forward_bilinear(p_bil, x, row_tile=rt))
        assert out_bil.shape == (N, COUT, 2 * H, 2 * W), out_bil.shape
        assert bool(jnp.all(jnp.isfinite(out_bil)))
        assert bool(jnp.allclose(out_bil, ref_bil, atol=5e-2, rtol=5e-2)), \
            (rt, float(jnp.max(jnp.abs(out_bil - ref_bil))))

    # 'deconvolution' branch: ConvTranspose2d(3x3, stride 2)
    p_dec = build_params(kp2, CIN, COUT, upsample_type="deconvolution")
    ref_dec = _ref_forward_deconv(p_dec, x)
    for rt in (None, 8):
        out_dec = jax.block_until_ready(upsample_forward_deconv(p_dec, x, row_tile=rt))
        assert out_dec.shape == (N, COUT, 2 * H, 2 * W), out_dec.shape
        assert bool(jnp.all(jnp.isfinite(out_dec)))
        assert bool(jnp.allclose(out_dec, ref_dec, atol=5e-2, rtol=5e-2)), \
            (rt, float(jnp.max(jnp.abs(out_dec - ref_dec))))

    print("KERNEL_OK")
</pallas_src>

<mosaic_0001>
module attributes {stable_mosaic.version = 11 : i64} {
  func.func @_conv1x1_bn_bilinear2x_kernel(%arg0: i32, %arg1: i32, %arg2: memref<1x16x16x4xf32, #tpu.memory_space<vmem>>, %arg3: memref<1x1x16x4xf32, #tpu.memory_space<vmem>>, %arg4: memref<1x1x16x4xf32, #tpu.memory_space<vmem>>, %arg5: memref<4x8xf32, #tpu.memory_space<vmem>>, %arg6: memref<1x8xf32, #tpu.memory_space<vmem>>, %arg7: memref<1x8xf32, #tpu.memory_space<vmem>>, %arg8: memref<1x16x2x16x16xf32, #tpu.memory_space<vmem>>) attributes {dimension_semantics = [#tpu.dimension_semantics<parallel>, #tpu.dimension_semantics<parallel>], iteration_bounds = array<i64: 2, 1>, scalar_prefetch = 0 : i64, scratch_operands = 0 : i64, tpu.core_type = #tpu.core_type<tc>, window_params = [{transform_indices = @transform_0, window_bounds = array<i64: 1, 16, 16, 4>}, {transform_indices = @transform_1, window_bounds = array<i64: 1, 1, 16, 4>}, {transform_indices = @transform_2, window_bounds = array<i64: 1, 1, 16, 4>}, {pipeline_mode = #tpu.pipeline_mode<synchronous>, transform_indices = @transform_3, window_bounds = array<i64: 4, 8>}, {pipeline_mode = #tpu.pipeline_mode<synchronous>, transform_indices = @transform_4, window_bounds = array<i64: 1, 8>}, {pipeline_mode = #tpu.pipeline_mode<synchronous>, transform_indices = @transform_5, window_bounds = array<i64: 1, 8>}, {transform_indices = @transform_6, window_bounds = array<i64: 1, 16, 2, 16, 16>}]} {
    %c0 = arith.constant 0 : index
    %c0_0 = arith.constant 0 : index
    %c0_1 = arith.constant 0 : index
    %c0_2 = arith.constant 0 : index
    %0 = vector.load %arg3[%c0, %c0_0, %c0_1, %c0_2] : memref<1x1x16x4xf32, #tpu.memory_space<vmem>>, vector<1x1x16x4xf32>
    %1 = vector.shape_cast %0 : vector<1x1x16x4xf32> to vector<1x16x4xf32>
    %c0_3 = arith.constant 0 : index
    %c0_4 = arith.constant 0 : index
    %c0_5 = arith.constant 0 : index
    %c0_6 = arith.constant 0 : index
    %2 = vector.load %arg2[%c0_3, %c0_4, %c0_5, %c0_6] : memref<1x16x16x4xf32, #tpu.memory_space<vmem>>, vector<1x16x16x4xf32>
    %3 = vector.shape_cast %2 : vector<1x16x16x4xf32> to vector<16x16x4xf32>
    %c0_7 = arith.constant 0 : index
    %c0_8 = arith.constant 0 : index
    %c0_9 = arith.constant 0 : index
    %c0_10 = arith.constant 0 : index
    %4 = vector.load %arg4[%c0_7, %c0_8, %c0_9, %c0_10] : memref<1x1x16x4xf32, #tpu.memory_space<vmem>>, vector<1x1x16x4xf32>
    %5 = vector.shape_cast %4 : vector<1x1x16x4xf32> to vector<1x16x4xf32>
    %6 = tpu.concatenate %1, %3, %5 in 0 : vector<1x16x4xf32>, vector<16x16x4xf32>, vector<1x16x4xf32> -> vector<18x16x4xf32>
    %7 = vector.shape_cast %6 : vector<18x16x4xf32> to vector<288x4xf32>
    %8 = arith.truncf %7 : vector<288x4xf32> to vector<288x4xbf16>
    %c0_11 = arith.constant 0 : index
    %c0_12 = arith.constant 0 : index
    %9 = vector.load %arg5[%c0_11, %c0_12] : memref<4x8xf32, #tpu.memory_space<vmem>>, vector<4x8xf32>
    %10 = arith.truncf %9 : vector<4x8xf32> to vector<4x8xbf16>
    %cst = arith.constant dense<0.000000e+00> : vector<288x8xf32>
    %11 = tpu.matmul %8, %10, %cst {dimension_numbers = #tpu.dot_dimension_numbers<[1], [0], [0], [1], [0, 0, 1, 1], [], []>} : vector<288x4xbf16>, vector<4x8xbf16>, vector<288x8xf32> -> vector<288x8xf32>
    %c0_13 = arith.constant 0 : index
    %c0_14 = arith.constant 0 : index
    %12 = vector.load %arg6[%c0_13, %c0_14] : memref<1x8xf32, #tpu.memory_space<vmem>>, vector<1x8xf32>
    %13 = vector.broadcast %12 : vector<1x8xf32> to vector<288x8xf32>
    %14 = arith.mulf %11, %13 : vector<288x8xf32>
    %c0_15 = arith.constant 0 : index
    %c0_16 = arith.constant 0 : index
    %15 = vector.load %arg7[%c0_15, %c0_16] : memref<1x8xf32, #tpu.memory_space<vmem>>, vector<1x8xf32>
    %16 = vector.broadcast %15 : vector<1x8xf32> to vector<288x8xf32>
    %17 = arith.addf %14, %16 : vector<288x8xf32>
    %cst_17 = arith.constant 0.000000e+00 : f32
    %18 = vector.broadcast %cst_17 : f32 to vector<288x8xf32>
    %19 = arith.maximumf %17, %18 : vector<288x8xf32>
    %20 = vector.shape_cast %19 : vector<288x8xf32> to vector<18x16x8xf32>
    %21 = vector.extract_strided_slice %20 {offsets = [0, 0, 0], sizes = [16, 16, 8], strides = [1, 1, 1]} : vector<18x16x8xf32> to vector<16x16x8xf32>
    %22 = vector.extract_strided_slice %20 {offsets = [1, 0, 0], sizes = [16, 16, 8], strides = [1, 1, 1]} : vector<18x16x8xf32> to vector<16x16x8xf32>
    %23 = vector.extract_strided_slice %20 {offsets = [2, 0, 0], sizes = [16, 16, 8], strides = [1, 1, 1]} : vector<18x16x8xf32> to vector<16x16x8xf32>
    %cst_18 = arith.constant 7.500000e-01 : f32
    %24 = vector.broadcast %cst_18 : f32 to vector<16x16x8xf32>
    %25 = arith.mulf %24, %22 : vector<16x16x8xf32>
    %cst_19 = arith.constant 2.500000e-01 : f32
    %26 = vector.broadcast %cst_19 : f32 to vector<16x16x8xf32>
    %27 = arith.mulf %26, %21 : vector<16x16x8xf32>
    %28 = arith.addf %25, %27 : vector<16x16x8xf32>
    %cst_20 = arith.constant 7.500000e-01 : f32
    %29 = vector.broadcast %cst_20 : f32 to vector<16x16x8xf32>
    %30 = arith.mulf %29, %22 : vector<16x16x8xf32>
    %cst_21 = arith.constant 2.500000e-01 : f32
    %31 = vector.broadcast %cst_21 : f32 to vector<16x16x8xf32>
    %32 = arith.mulf %31, %23 : vector<16x16x8xf32>
    %33 = arith.addf %30, %32 : vector<16x16x8xf32>
    %34 = vector.extract_strided_slice %28 {offsets = [0, 0, 0], sizes = [16, 1, 8], strides = [1, 1, 1]} : vector<16x16x8xf32> to vector<16x1x8xf32>
    %35 = vector.extract_strided_slice %28 {offsets = [0, 0, 0], sizes = [16, 15, 8], strides = [1, 1, 1]} : vector<16x16x8xf32> to vector<16x15x8xf32>
    %36 = tpu.concatenate %34, %35 in 1 : vector<16x1x8xf32>, vector<16x15x8xf32> -> vector<16x16x8xf32>
    %37 = vector.extract_strided_slice %28 {offsets = [0, 1, 0], sizes = [16, 15, 8], strides = [1, 1, 1]} : vector<16x16x8xf32> to vector<16x15x8xf32>
    %38 = vector.extract_strided_slice %28 {offsets = [0, 15, 0], sizes = [16, 1, 8], strides = [1, 1, 1]} : vector<16x16x8xf32> to vector<16x1x8xf32>
    %39 = tpu.concatenate %37, %38 in 1 : vector<16x15x8xf32>, vector<16x1x8xf32> -> vector<16x16x8xf32>
    %cst_22 = arith.constant 7.500000e-01 : f32
    %40 = vector.broadcast %cst_22 : f32 to vector<16x16x8xf32>
    %41 = arith.mulf %40, %28 : vector<16x16x8xf32>
    %cst_23 = arith.constant 2.500000e-01 : f32
    %42 = vector.broadcast %cst_23 : f32 to vector<16x16x8xf32>
    %43 = arith.mulf %42, %36 : vector<16x16x8xf32>
    %44 = arith.addf %41, %43 : vector<16x16x8xf32>
    %cst_24 = arith.constant 7.500000e-01 : f32
    %45 = vector.broadcast %cst_24 : f32 to vector<16x16x8xf32>
    %46 = arith.mulf %45, %28 : vector<16x16x8xf32>
    %cst_25 = arith.constant 2.500000e-01 : f32
    %47 = vector.broadcast %cst_25 : f32 to vector<16x16x8xf32>
    %48 = arith.mulf %47, %39 : vector<16x16x8xf32>
    %49 = arith.addf %46, %48 : vector<16x16x8xf32>
    %50 = vector.extract_strided_slice %33 {offsets = [0, 0, 0], sizes = [16, 1, 8], strides = [1, 1, 1]} : vector<16x16x8xf32> to vector<16x1x8xf32>
    %51 = vector.extract_strided_slice %33 {offsets = [0, 0, 0], sizes = [16, 15, 8], strides = [1, 1, 1]} : vector<16x16x8xf32> to vector<16x15x8xf32>
    %52 = tpu.concatenate %50, %51 in 1 : vector<16x1x8xf32>, vector<16x15x8xf32> -> vector<16x16x8xf32>
    %53 = vector.extract_strided_slice %33 {offsets = [0, 1, 0], sizes = [16, 15, 8], strides = [1, 1, 1]} : vector<16x16x8xf32> to vector<16x15x8xf32>
    %54 = vector.extract_strided_slice %33 {offsets = [0, 15, 0], sizes = [16, 1, 8], strides = [1, 1, 1]} : vector<16x16x8xf32> to vector<16x1x8xf32>
    %55 = tpu.concatenate %53, %54 in 1 : vector<16x15x8xf32>, vector<16x1x8xf32> -> vector<16x16x8xf32>
    %cst_26 = arith.constant 7.500000e-01 : f32
    %56 = vector.broadcast %cst_26 : f32 to vector<16x16x8xf32>
    %57 = arith.mulf %56, %33 : vector<16x16x8xf32>
    %cst_27 = arith.constant 2.500000e-01 : f32
    %58 = vector.broadcast %cst_27 : f32 to vector<16x16x8xf32>
    %59 = arith.mulf %58, %52 : vector<16x16x8xf32>
    %60 = arith.addf %57, %59 : vector<16x16x8xf32>
    %cst_28 = arith.constant 7.500000e-01 : f32
    %61 = vector.broadcast %cst_28 : f32 to vector<16x16x8xf32>
    %62 = arith.mulf %61, %33 : vector<16x16x8xf32>
    %cst_29 = arith.constant 2.500000e-01 : f32
    %63 = vector.broadcast %cst_29 : f32 to vector<16x16x8xf32>
    %64 = arith.mulf %63, %55 : vector<16x16x8xf32>
    %65 = arith.addf %62, %64 : vector<16x16x8xf32>
    %66 = tpu.concatenate %44, %49 in 2 : vector<16x16x8xf32>, vector<16x16x8xf32> -> vector<16x16x16xf32>
    %c0_30 = arith.constant 0 : index
    %c0_31 = arith.constant 0 : index
    %c0_32 = arith.constant 0 : index
    %c0_33 = arith.constant 0 : index
    %c0_34 = arith.constant 0 : index
    %67 = vector.load %arg8[%c0_30, %c0_31, %c0_32, %c0_33, %c0_34] : memref<1x16x2x16x16xf32, #tpu.memory_space<vmem>>, vector<1x16x1x16x16xf32>
    %68 = vector.shape_cast %67 : vector<1x16x1x16x16xf32> to vector<16x16x16xf32>
    %69 = vector.shape_cast %66 : vector<16x16x16xf32> to vector<1x16x1x16x16xf32>
    tpu.vector_store %arg8[%c0_30, %c0_31, %c0_32, %c0_33, %c0_34], %69 {strides = array<i32>} : memref<1x16x2x16x16xf32, #tpu.memory_space<vmem>>, vector<1x16x1x16x16xf32>,
    %70 = tpu.concatenate %60, %65 in 2 : vector<16x16x8xf32>, vector<16x16x8xf32> -> vector<16x16x16xf32>
    %c0_35 = arith.constant 0 : index
    %c0_36 = arith.constant 0 : index
    %c1 = arith.constant 1 : index
    %c0_37 = arith.constant 0 : index
    %c0_38 = arith.constant 0 : index
    %71 = vector.load %arg8[%c0_35, %c0_36, %c1, %c0_37, %c0_38] : memref<1x16x2x16x16xf32, #tpu.memory_space<vmem>>, vector<1x16x1x16x16xf32>
    %72 = vector.shape_cast %71 : vector<1x16x1x16x16xf32> to vector<16x16x16xf32>
    %73 = vector.shape_cast %70 : vector<16x16x16xf32> to vector<1x16x1x16x16xf32>
    tpu.vector_store %arg8[%c0_35, %c0_36, %c1, %c0_37, %c0_38], %73 {strides = array<i32>} : memref<1x16x2x16x16xf32, #tpu.memory_space<vmem>>, vector<1x16x1x16x16xf32>,
    return
  }
  func.func @transform_0(%arg0: i32, %arg1: i32) -> (i32, i32, i32, i32) {
    %c0_i32 = arith.constant 0 : i32
    %c0_i32_0 = arith.constant 0 : i32
    %c0_i32_1 = arith.constant 0 : i32
    return %arg0, %arg1, %c0_i32, %c0_i32_0 : i32, i32, i32, i32
  }
  func.func @transform_1(%arg0: i32, %arg1: i32) -> (i32, i32, i32, i32) {
    %c16_i32 = arith.constant 16 : i32
    %0 = arith.muli %arg1, %c16_i32 : i32
    %c1_i32 = arith.constant 1 : i32
    %1 = arith.subi %0, %c1_i32 : i32
    %c0_i32 = arith.constant 0 : i32
    %2 = arith.maxsi %1, %c0_i32 : i32
    %c0_i32_0 = arith.constant 0 : i32
    %c0_i32_1 = arith.constant 0 : i32
    %c0_i32_2 = arith.constant 0 : i32
    return %arg0, %2, %c0_i32_0, %c0_i32_1 : i32, i32, i32, i32
  }
  func.func @transform_2(%arg0: i32, %arg1: i32) -> (i32, i32, i32, i32) {
    %c1_i32 = arith.constant 1 : i32
    %0 = arith.addi %arg1, %c1_i32 : i32
    %c16_i32 = arith.constant 16 : i32
    %1 = arith.muli %0, %c16_i32 : i32
    %c15_i32 = arith.constant 15 : i32
    %2 = arith.minsi %1, %c15_i32 : i32
    %c0_i32 = arith.constant 0 : i32
    %c0_i32_0 = arith.constant 0 : i32
    %c0_i32_1 = arith.constant 0 : i32
    return %arg0, %2, %c0_i32, %c0_i32_0 : i32, i32, i32, i32
  }
  func.func @transform_3(%arg0: i32, %arg1: i32) -> (i32, i32) {
    %c0_i32 = arith.constant 0 : i32
    %c0_i32_0 = arith.constant 0 : i32
    %c0_i32_1 = arith.constant 0 : i32
    return %c0_i32, %c0_i32_0 : i32, i32
  }
  func.func @transform_4(%arg0: i32, %arg1: i32) -> (i32, i32) {
    %c0_i32 = arith.constant 0 : i32
    %c0_i32_0 = arith.constant 0 : i32
    %c0_i32_1 = arith.constant 0 : i32
    return %c0_i32, %c0_i32_0 : i32, i32
  }
  func.func @transform_5(%arg0: i32, %arg1: i32) -> (i32, i32) {
    %c0_i32 = arith.constant 0 : i32
    %c0_i32_0 = arith.constant 0 : i32
    %c0_i32_1 = arith.constant 0 : i32
    return %c0_i32, %c0_i32_0 : i32, i32
  }
  func.func @transform_6(%arg0: i32, %arg1: i32) -> (i32, i32, i32, i32, i32) {
    %c0_i32 = arith.constant 0 : i32
    %c0_i32_0 = arith.constant 0 : i32
    %c0_i32_1 = arith.constant 0 : i32
    %c0_i32_2 = arith.constant 0 : i32
    return %arg0, %arg1, %c0_i32, %c0_i32_0, %c0_i32_1 : i32, i32, i32, i32, i32
  }
}

</mosaic_0001>

<bundles_post_ra>
// kernel: upsample_forward_bilinear.1
= control target key start
LH: loop header
LB: loop body
LE: loop exit
PB: predicated region body
PF: predicated region fallthrough
CT: control target
= control target key end

     0   :  { %s2339_s21 = smov 0   ;;  %s2341_s22 = smov 0   ;;  %s4087_s0 = inlined_call_operand.vmem [shape: f32[2,16,16,4], index: 0, kind: input, shape index: {}, may-alias: {0,1,2}]   ;;  %s4088_s1 = inlined_call_operand.vmem [shape: f32[2,16,16,4], index: 1, kind: input, shape index: {}, may-alias: {0,1,2}]   ;;  %s4089_s2 = inlined_call_operand.vmem [shape: f32[2,16,16,4], index: 2, kind: input, shape index: {}, may-alias: {0,1,2}]   ;;  %s4090_s3 = inlined_call_operand.vmem [shape: f32[4,8], index: 3, kind: input, shape index: {}]   ;;  %s4091_s4 = inlined_call_operand.vmem [shape: f32[1,8], index: 4, kind: input, shape index: {}]   ;;  %s4092_s5 = inlined_call_operand.vmem [shape: f32[1,8], index: 5, kind: input, shape index: {}]   ;;  %s4093_s6 = inlined_call_operand.vmem [shape: f32[2,16,2,16,16], index: 6, kind: output, shape index: {}]  }
   0x1   :  { %s2343_s23 = smov 0  }
   0x2 LB: > { %s28_s24 = sadd.s32 1, %s2297_s22  ;;  %p2182_p0 = scmp.ge.s32.totalorder %s2301_s23, 1  ;;  %s2301_s23 = sphi %s2343_s23, %s16_s23   ;;  %s2297_s22 = sphi %s2341_s22, %s4443_s22   ;;  %s2293_s21 = sphi %s2339_s21, %s4442_s21  }
   0x3   : > { %p30_p1 = scmp.ge.s32.totalorder %s28_s24, 2  ;;  %p298_p2 = scmp.lt.s32.totalorder %s2301_s23, 3 }
   0x5   : > { %s4445_s24 = smov (%p30_p1, %s28_s24), 0  ;;  %p299_p3 = pnand %p2182_p0, %p298_p2 }
   0x7   : > { %302 = sbr.rel (%p299_p3) target bundleno = 485 (0x1e5), region = 44 }
   0xc   : > { %v475_v0 = vld [vmem:[%s4090_s3] sm:$0xf]  ;;  %vm532_vm0 = vcmask 1041408   ;;  %p365_p4 = scmp.lt.s32.totalorder %s2293_s21, 1  ;;  %vm477_vm1 = vcmask 31744   ;;  %vm915_vm2 = vcmask 1040384  }
   0xd   : > { %v476_v1 = vpack.c.bf16 %v475_v0, %v475_v0  ;;  %v2432_v61 = vld [vmem:[%s4091_s4] ss:$0 sm:$0xff]  ;;  %vm1012_vm3 = vcmask 1046528   ;;  %s2303_s18 = smov 8   ;;  %vm1781_vm4 = vcmask 64512   ;;  %vm1814_vm5 = vcmask 130048  }
   0xe   : > { %s4447_s21 = smov (!%p365_p4, %s2293_s21), 1 }
   0xf   : > { %v534_v2 = vsel %vm532_vm0, %v476_v1, 0  ;;  %s2363_s27 = sshll.u32 %s4447_s21, 8  ;;  %v2442_v1 = vld [vmem:[%s4092_s5] ss:$0 sm:$0xff]  ;;  %s2247_s19 = sshll.u32 %s4447_s21, 9 }
  0x10   : > { %543 = vmatpush.bf16.msra.mxu0 %v534_v2  ;;  %2249 = vmatpush.bf16.msra.mxu1 %v534_v2  ;;  %s2369_s30 = scalar_lea.vmem %s4087_s0, %s2363_s27  ;;  %s387_s9 = scalar_lea.vmem %s4088_s1, %s2363_s27 }
  0x11   : > { %2250 = vmatpush.bf16.msra.mxu2 %v534_v2  ;;  %2251 = vmatpush.bf16.msra.mxu3 %v534_v2  ;;  %v421_v3 = vld [vmem:[%s387_s9] sm:$0xff]  ;;  %v422_v4 = vld [vmem:[%s387_s9 + $0x8] sm:$0xff]  ;;  %v441_v8 = vld [vmem:[%s2369_s30 + $0x90] sm:$0xff]  ;;  %s2246_s10 = sadd.s32 240, %s2363_s27  ;;  %s3159_s25 = scalar_lea.vmem %s4093_s6, %s2247_s19 }
  0x12   : > { %v431_v5 = vld [vmem:[%s2369_s30 + $0x40] sm:$0xff]  ;;  %v457_v6 = vpack.c.bf16 %v422_v4, %v421_v3  ;;  %v432_v7 = vld [vmem:[%s2369_s30 + $0x48] sm:$0xff]  ;;  %v442_v9 = vld [vmem:[%s2369_s30 + $0x98] sm:$0xff]  ;;  %s404_s13 = scalar_lea.vmem %s4089_s2, %s2246_s10 }
  0x13   : > { %v462_v10 = vpack.c.bf16 %v432_v7, %v431_v5  ;;  %v467_v11 = vpack.c.bf16 %v442_v9, %v441_v8  ;;  %v451_v12 = vld [vmem:[%s2369_s30 + $0xe0] sm:$0xff]  ;;  %v452_v13 = vld [vmem:[%s2369_s30 + $0xe8] sm:$0xff]  ;;  %v433_v17 = vld [vmem:[%s2369_s30 + $0x50] sm:$0xff] }
  0x14   : > { %2191 = vmatmul.msk.bf16.vlgmr.msra.gmra.mxu0 %vm477_vm1, %v457_v6  ;;  %v472_v14 = vpack.c.bf16 %v452_v13, %v451_v12  ;;  %v423_v15 = vld [vmem:[%s2369_s30] sm:$0xff]  ;;  %v424_v16 = vld [vmem:[%s2369_s30 + $0x8] sm:$0xff]  ;;  %v434_v18 = vld [vmem:[%s2369_s30 + $0x58] sm:$0xff] }
  0x15   : > { %2196 = vmatmul.msk.bf16.vlgmr.msra.gmra.mxu1 %vm477_vm1, %v462_v10  ;;  %2201 = vmatmul.msk.bf16.vlgmr.msra.gmra.mxu2 %vm477_vm1, %v467_v11  ;;  %v443_v19 = vld [vmem:[%s2369_s30 + $0xa0] sm:$0xff]  ;;  %v444_v20 = vld [vmem:[%s2369_s30 + $0xa8] sm:$0xff]  ;;  %v453_v21 = vld [vmem:[%s2369_s30 + $0xf0] sm:$0xff]  ;;  %v458_v23 = vpack.c.bf16 %v424_v16, %v423_v15  ;;  %v463_v24 = vpack.c.bf16 %v434_v18, %v433_v17 }
  0x16   : > { %2206 = vmatmul.msk.bf16.vlgmr.msra.gmra.mxu3 %vm477_vm1, %v472_v14  ;;  %v454_v22 = vld [vmem:[%s2369_s30 + $0xf8] sm:$0xff]  ;;  %v468_v25 = vpack.c.bf16 %v444_v20, %v443_v19  ;;  %v425_v27 = vld [vmem:[%s2369_s30 + $0x10] sm:$0xff]  ;;  %v435_v29 = vld [vmem:[%s2369_s30 + $0x60] sm:$0xff] }
  0x17   : > { %v473_v26 = vpack.c.bf16 %v454_v22, %v453_v21  ;;  %v426_v28 = vld [vmem:[%s2369_s30 + $0x18] sm:$0xff]  ;;  %v436_v30 = vld [vmem:[%s2369_s30 + $0x68] sm:$0xff]  ;;  %v445_v31 = vld [vmem:[%s2369_s30 + $0xb0] sm:$0xff] }
  0x18   : > { %v446_v32 = vld [vmem:[%s2369_s30 + $0xb8] sm:$0xff]  ;;  %v455_v33 = vld [vmem:[%s404_s13] sm:$0xff]  ;;  %v456_v34 = vld [vmem:[%s404_s13 + $0x8] sm:$0xff]  ;;  %v459_v35 = vpack.c.bf16 %v426_v28, %v425_v27  ;;  %v464_v36 = vpack.c.bf16 %v436_v30, %v435_v29 }
  0x19   : > { %v469_v37 = vpack.c.bf16 %v446_v32, %v445_v31  ;;  %v474_v38 = vpack.c.bf16 %v456_v34, %v455_v33  ;;  %v427_v39 = vld [vmem:[%s2369_s30 + $0x20] sm:$0xff]  ;;  %v428_v40 = vld [vmem:[%s2369_s30 + $0x28] sm:$0xff]  ;;  %v437_v41 = vld [vmem:[%s2369_s30 + $0x70] sm:$0xff] }
  0x1a   : > { %v438_v42 = vld [vmem:[%s2369_s30 + $0x78] sm:$0xff]  ;;  %v447_v43 = vld [vmem:[%s2369_s30 + $0xc0] sm:$0xff]  ;;  %v448_v44 = vld [vmem:[%s2369_s30 + $0xc8] sm:$0xff]  ;;  %v460_v45 = vpack.c.bf16 %v428_v40, %v427_v39 }
  0x1b   : > { %v465_v46 = vpack.c.bf16 %v438_v42, %v437_v41  ;;  %v470_v47 = vpack.c.bf16 %v448_v44, %v447_v43  ;;  %v429_v48 = vld [vmem:[%s2369_s30 + $0x30] sm:$0xff]  ;;  %v430_v49 = vld [vmem:[%s2369_s30 + $0x38] sm:$0xff]  ;;  %v439_v50 = vld [vmem:[%s2369_s30 + $0x80] sm:$0xff] }
  0x1c   : > { %v440_v51 = vld [vmem:[%s2369_s30 + $0x88] sm:$0xff]  ;;  %v449_v52 = vld [vmem:[%s2369_s30 + $0xd0] sm:$0xff]  ;;  %v450_v53 = vld [vmem:[%s2369_s30 + $0xd8] sm:$0xff]  ;;  %v461_v54 = vpack.c.bf16 %v430_v49, %v429_v48 }
  0x1d   : > { %v466_v55 = vpack.c.bf16 %v440_v51, %v439_v50  ;;  %v471_v56 = vpack.c.bf16 %v450_v53, %v449_v52 }
  0x24   : > { %2192 = vmatmul.msk.bf16.gmra.mxu0 %vm477_vm1, %v458_v23 }
  0x25   : > { %2197 = vmatmul.msk.bf16.gmra.mxu1 %vm477_vm1, %v463_v24  ;;  %2202 = vmatmul.msk.bf16.gmra.mxu2 %vm477_vm1, %v468_v25 }
  0x26   : > { %2207 = vmatmul.msk.bf16.gmra.mxu3 %vm477_vm1, %v473_v26 }
  0x34   : > { %2193 = vmatmul.msk.bf16.gmra.mxu0 %vm477_vm1, %v459_v35 }
  0x35   : > { %2198 = vmatmul.msk.bf16.gmra.mxu1 %vm477_vm1, %v464_v36  ;;  %2203 = vmatmul.msk.bf16.gmra.mxu2 %vm477_vm1, %v469_v37 }
  0x36   : > { %2208 = vmatmul.msk.bf16.gmra.mxu3 %vm477_vm1, %v474_v38 }
  0x44   : > { %2194 = vmatmul.msk.bf16.gmra.mxu0 %vm477_vm1, %v460_v45 }
  0x45   : > { %2199 = vmatmul.msk.bf16.gmra.mxu1 %vm477_vm1, %v465_v46  ;;  %2204 = vmatmul.msk.bf16.gmra.mxu2 %vm477_vm1, %v470_v47 }
  0x54   : > { %2195 = vmatmul.msk.bf16.gmra.mxu0 %vm477_vm1, %v461_v54 }
  0x55   : > { %2200 = vmatmul.msk.bf16.gmra.mxu1 %vm477_vm1, %v466_v55  ;;  %2205 = vmatmul.msk.bf16.gmra.mxu2 %vm477_vm1, %v471_v56 }
  0x91   : > { %v545_v57 = vpop.f32.mrf.mxu0 }
  0x92   : > { %v570_v58 = vpop.f32.mrf.mxu1  ;;  %v639_v13 = vmul.f32 %v2432_v61, %v545_v57 }
  0x93   : > { %v649_v0 = vmul.f32 %v2432_v61, %v570_v58 }
  0x94   : > { %v679_v24 = vadd.f32 %v2442_v1, %v639_v13 }
  0x95   : > { %v2445_v2 = vadd.f32 %v2442_v1, %v649_v0 }
  0x96   : > { %v715_v33 = vmax.f32 %v679_v24, 0.0 }
  0x97   : > { %v725_v6 = vmax.f32 %v2445_v2, 0.0 }
  0x98   : > { %v2434_v62 = vpop.f32.mrf.mxu2  ;;  %v783_v43 = vmul.f32 0.25, %v715_v33 }
  0x99   : > { %v547_v59 = vpop.f32.mrf.mxu0  ;;  %v2436_v63 = vpop.f32.mrf.mxu3  ;;  %v2460_v14 = vmul.f32 0.25, %v725_v6 }
  0x9a   : > { %v572_v60 = vpop.f32.mrf.mxu1  ;;  %v640_v15 = vmul.f32 %v2432_v61, %v547_v59 }
  0x9b   : > { %v650_v7 = vmul.f32 %v2432_v61, %v572_v60 }
  0x9c   : > { %v680_v26 = vadd.f32 %v2442_v1, %v640_v15 }
  0x9d   : > { %v2464_v16 = vadd.f32 %v2442_v1, %v650_v7 }
  0x9e   : > { %v716_v36 = vmax.f32 %v680_v26, 0.0 }
  0x9f   : > { %v726_v27 = vmax.f32 %v2464_v16, 0.0 }
  0xa0   : > { %v597_v9 = vpop.f32.mrf.mxu2  ;;  %v784_v46 = vmul.f32 0.25, %v716_v36 }
  0xa1   : > { %v550_v3 = vpop.f32.mrf.mxu0  ;;  %v2453_v10 = vpop.f32.mrf.mxu3  ;;  %v2488_v37 = vmul.f32 0.25, %v726_v27 }
  0xa2   : > { %v575_v4 = vpop.f32.mrf.mxu1  ;;  %v641_v11 = vmul.f32 %v2432_v61, %v550_v3  ;;  %v659_v3 = vmul.f32 %v2432_v61, %v2434_v62 }
  0xa3   : > { %v651_v5 = vmul.f32 %v2432_v61, %v575_v4  ;;  %4220 = vst [vmem:[#allocation2_spill] sm:$0xff] %v2488_v37  ;;  %v660_v4 = vmul.f32 %v2432_v61, %v597_v9  ;;  %v2531_v9 = vmul.f32 0.75, %v725_v6 }
  0xa4   : > { %v2471_v19 = vadd.f32 %v2442_v1, %v641_v11  ;;  %v699_v24 = vadd.f32 %v2442_v1, %v659_v3 }
  0xa5   : > { %v2451_v8 = vadd.f32 %v2442_v1, %v651_v5 }
  0xa6   : > { %v717_v30 = vmax.f32 %v2471_v19, 0.0 }
  0xa7   : > { %v727_v12 = vmax.f32 %v2451_v8, 0.0  ;;  %v2549_v8 = vmul.f32 0.75, %v726_v27 }
  0xa8   : > { %v600_v34 = vpop.f32.mrf.mxu2  ;;  %v2495_v40 = vmul.f32 0.75, %v717_v30 }
  0xa9   : > { %v2468_v17 = vmul.f32 0.75, %v727_v12  ;;  %v552_v18 = vpop.f32.mrf.mxu0  ;;  %v2486_v35 = vpop.f32.mrf.mxu3  ;;  %v661_v5 = vmul.f32 %v2432_v61, %v600_v34 }
  0xaa   : > { %v642_v20 = vmul.f32 %v2432_v61, %v552_v18  ;;  %v577_v21 = vpop.f32.mrf.mxu1  ;;  %v2504_v48 = vadd.f32 %v783_v43, %v2495_v40  ;;  %v670_v18 = vmul.f32 %v2432_v61, %v2453_v10 }
  0xab   : > { %v825_v22 = vadd.f32 %v2460_v14, %v2468_v17  ;;  %v652_v23 = vmul.f32 %v2432_v61, %v577_v21  ;;  %v2545_v26 = vadd.f32 %v2442_v1, %v661_v5 }
  0xac   : > { %v2479_v25 = vadd.f32 %v2442_v1, %v642_v20  ;;  %4221 = vst [vmem:[#allocation3_spill] sm:$0xff] %v2504_v48  ;;  %v4094_v57 = vrot.slane %v2504_v48, 7  ;;  %v1013_v7 = vrot.slane %v2504_v48, 1  ;;  %v2561_v33 = vadd.f32 %v2442_v1, %v670_v18 }
  0xad   : > { %v692_v28 = vadd.f32 %v2442_v1, %v652_v23  ;;  %v931_v29 = vrot.slane %v825_v22, 7  ;;  %v1119_v44 = vmul.f32 0.75, %v825_v22  ;;  %v1028_v54 = vrot.slane %v825_v22, 1 }
  0xae   : > { %v718_v31 = vmax.f32 %v2479_v25, 0.0  ;;  %v996_v62 = vsel %vm915_vm2, %v2504_v48, %v4094_v57  ;;  %v1109_v34 = vmul.f32 0.75, %v2504_v48  ;;  %v737_v43 = vmax.f32 %v2545_v26, 0.0 }
  0xaf   : > { %v728_v32 = vmax.f32 %v692_v28, 0.0  ;;  %v1001_v39 = vsel %vm915_vm2, %v825_v22, %v931_v29  ;;  %v2535_v22 = vmul.f32 0.25, %v727_v12  ;;  %v4239_v48 = vmax.f32 %v2561_v33, 0.0 }
  0xb0   : > { %v2499_v41 = vmul.f32 0.75, %v718_v31  ;;  %v1151_v45 = vmul.f32 0.25, %v1001_v39  ;;  %v602_v55 = vpop.f32.mrf.mxu2 }
  0xb1   : > { %v2490_v38 = vmul.f32 0.75, %v728_v32  ;;  %v627_v56 = vpop.f32.mrf.mxu3  ;;  %v555_v58 = vpop.f32.mrf.mxu0  ;;  %v662_v11 = vmul.f32 %v2432_v61, %v602_v55  ;;  %v2537_v23 = vmul.f32 0.25, %v728_v32  ;;  %v2558_v32 = vadd.f32 %v2442_v1, %v660_v4 }
  0xb2   : > { %v2506_v49 = vadd.f32 %v1151_v45, %v1119_v44  ;;  %v2509_v50 = vadd.f32 %v784_v46, %v2499_v41  ;;  %v672_v13 = vmul.f32 %v2432_v61, %v627_v56  ;;  %v2567_v27 = vadd.f32 %v2535_v22, %v2531_v9  ;;  %v580_v26 = vpop.f32.mrf.mxu1 }
  0xb3   : > { %v826_v42 = vadd.f32 %v2488_v37, %v2490_v38  ;;  %v2552_v12 = vadd.f32 %v2442_v1, %v662_v11  ;;  %v2571_v39 = vadd.f32 %v2537_v23, %v2549_v8  ;;  %v735_v45 = vmax.f32 %v699_v24, 0.0 }
  0xb4   : > { %4222 = vst [vmem:[#allocation4_spill] sm:$0xff] %v2506_v49  ;;  %v1014_v0 = vrot.slane %v2509_v50, 1  ;;  %v2555_v28 = vadd.f32 %v2442_v1, %v672_v13  ;;  %v1409_v56 = vrot.slane %v2567_v27, 1  ;;  %v643_v3 = vmul.f32 %v2432_v61, %v555_v58 }
  0xb5   : > { %v1029_v47 = vrot.slane %v826_v42, 1  ;;  %4223 = vst [vmem:[#allocation5_spill] sm:$0xff] %v2509_v50  ;;  %v932_v53 = vrot.slane %v826_v42, 7  ;;  %v1120_v59 = vmul.f32 0.75, %v826_v42  ;;  %v738_v46 = vmax.f32 %v2552_v12, 0.0 }
  0xb6   : > { %v1015_v10 = vsel %vm1012_vm3, %v1013_v7, %v1014_v0  ;;  %4225 = vst [vmem:[#allocation7_spill] sm:$0xff] %v2567_v27  ;;  %v2601_v13 = vmul.f32 0.25, %v735_v45  ;;  %v2611_v18 = vmul.f32 0.75, %v2571_v39  ;;  %v2625_v12 = vmul.f32 0.75, %v2567_v27 }
  0xb7   : > { %v1098_v51 = vsel %vm1012_vm3, %v1029_v47, %v826_v42  ;;  %v1030_v60 = vsel %vm1012_vm3, %v1028_v54, %v1029_v47  ;;  %v933_v16 = vsel %vm915_vm2, %v931_v29, %v932_v53  ;;  %v1141_v29 = vmul.f32 0.25, %v996_v62  ;;  %4226 = vst [vmem:[#allocation8_spill] sm:$0xff] %v2571_v39 }
  0xb8   : > { %v1216_v52 = vmul.f32 0.25, %v1098_v51  ;;  %v1152_v20 = vmul.f32 0.25, %v933_v16  ;;  %v1215_v21 = vmul.f32 0.25, %v1030_v60  ;;  %v1205_v36 = vmul.f32 0.25, %v1015_v10  ;;  %4230 = vst [vmem:[#allocation12_spill] sm:$0xff] %v2611_v18 }
  0xb9   : > { %v669_v42 = vmul.f32 %v2432_v61, %v2436_v63  ;;  %v4095_v47 = vmax.f32 %v2555_v28, 0.0  ;;  %v557_v51 = vpop.f32.mrf.mxu0  ;;  %v4096_v53 = vmax.f32 %v2561_v33, 0.0  ;;  %v671_v54 = vmul.f32 %v2432_v61, %v2486_v35  ;;  %4231 = vst [vmem:[#allocation13_spill] sm:$0xff] %v2625_v12 }
  0xba   : > { %v1248_v15 = vadd.f32 %v1216_v52, %v1120_v59  ;;  %v2547_v2 = vadd.f32 %v1152_v20, %v1120_v59  ;;  %v1247_v6 = vadd.f32 %v1215_v21, %v1119_v44  ;;  %v2576_v44 = vadd.f32 %v1141_v29, %v1109_v34 }
  0xbb   : > { %v736_v52 = vmax.f32 %v2558_v32, 0.0  ;;  %v1237_v55 = vadd.f32 %v1205_v36, %v1109_v34  ;;  %v1410_v63 = vrot.slane %v2571_v39, 1  ;;  %v709_v59 = vadd.f32 %v2442_v1, %v669_v42  ;;  %v605_v36 = vpop.f32.mrf.mxu2 }
  0xbc   : > { %1707 = vrot.lane.b32.xlu2 %v1248_v15, %s2303_s18  ;;  %4224 = vst [vmem:[#allocation6_spill] sm:$0xff] %v2547_v2  ;;  %1705 = vrot.lane.b32.xlu1 %v1247_v6, %s2303_s18  ;;  %v2587_v60 = vmul.f32 0.75, %v737_v43  ;;  %v644_v4 = vmul.f32 %v2432_v61, %v557_v51  ;;  %v2592_v5 = vmul.f32 0.75, %v738_v46  ;;  %v2596_v35 = vmul.f32 0.75, %v4095_v47 }
  0xbd   : > { %4227 = vst [vmem:[#allocation9_spill] sm:$0xff] %v2576_v44  ;;  %1685 = vrot.lane.b32.xlu0 %v1237_v55, %s2303_s18  ;;  %v1481_v7 = vsel %vm1012_vm3, %v1410_v63, %v2571_v39  ;;  %v1411_v11 = vsel %vm1012_vm3, %v1409_v56, %v1410_v63  ;;  %v2603_v15 = vmul.f32 0.25, %v736_v52  ;;  %v2607_v58 = vmul.f32 0.25, %v4096_v53 }
  0xbe   : > { %v711_v16 = vadd.f32 %v2442_v1, %v671_v54  ;;  %v1598_v20 = vmul.f32 0.25, %v1481_v7  ;;  %v1597_v21 = vmul.f32 0.25, %v1411_v11  ;;  %v1093_v62 = vsel %vm1012_vm3, %v1014_v0, %v2509_v50 }
  0xbf   : > { %4228 = vst [vmem:[#allocation10_spill] sm:$0xff] %v2603_v15  ;;  %v745_v10 = vmax.f32 %v709_v59, 0.0  ;;  %v2619_v24 = vadd.f32 %v2601_v13, %v2587_v60  ;;  %v2622_v6 = vadd.f32 %v2442_v1, %v644_v4  ;;  %v2629_v29 = vadd.f32 %v2603_v15, %v2592_v5 }
  0xc0   : > { %4229 = vst [vmem:[#allocation11_spill] sm:$0xff] %v2607_v58  ;;  %v2633_v32 = vadd.f32 %v2607_v58, %v2596_v35  ;;  %v683_v0 = vadd.f32 %v2442_v1, %v643_v3  ;;  %v1630_v34 = vadd.f32 %v1598_v20, %v2611_v18  ;;  %v1629_v42 = vadd.f32 %v1597_v21, %v2625_v12 }
  0xc1   : > { %4232 = vst [vmem:[#allocation14_spill] sm:$0xff] %v2629_v29  ;;  %v2639_v51 = vmul.f32 0.75, %v2509_v50  ;;  %v1206_v54 = vmul.f32 0.25, %v1093_v62  ;;  %v2641_v55 = vmul.f32 0.75, %v735_v45  ;;  %v747_v63 = vmax.f32 %v711_v16, 0.0  ;;  %v560_v12 = vpop.f32.mrf.mxu0 }
  0xc2   : > { %4233 = vst [vmem:[#allocation15_spill] sm:$0xff] %v2633_v32  ;;  %v2644_v56 = vmul.f32 0.75, %v745_v10  ;;  %v653_v59 = vmul.f32 %v2432_v61, %v580_v26  ;;  %v720_v3 = vmax.f32 %v2622_v6, 0.0  ;;  %v719_v7 = vmax.f32 %v683_v0, 0.0 }
  0xc3   : > { %4234 = vst [vmem:[#allocation16_spill] sm:$0xff] %v2639_v51  ;;  %v1238_v4 = vadd.f32 %v1206_v54, %v2639_v51  ;;  %v1043_v11 = vrot.slane %v2619_v24, 1  ;;  %v1044_v20 = vrot.slane %v2629_v29, 1  ;;  %v1059_v45 = vrot.slane %v2633_v32, 1 }
  0xc4   : > { %1897 = vrot.lane.b32.xlu2 %v1630_v34, %s2303_s18  ;;  %1895 = vrot.lane.b32.xlu1 %v1629_v42, %s2303_s18  ;;  %v2653_v16 = vmul.f32 0.25, %v745_v10  ;;  %v2655_v21 = vmul.f32 0.75, %v736_v52  ;;  %v2657_v62 = vmul.f32 0.25, %v737_v43  ;;  %v2659_v26 = vmul.f32 0.25, %v738_v46  ;;  %v630_v52 = vpop.f32.mrf.mxu3 }
  0xc5   : > { %1687 = vrot.lane.b32.xlu0 %v1238_v4, %s2303_s18  ;;  %v2662_v6 = vmul.f32 0.75, %v747_v63  ;;  %v1045_v0 = vsel %vm1012_vm3, %v1043_v11, %v1044_v20  ;;  %v1108_v34 = vsel %vm1012_vm3, %v1059_v45, %v2633_v32  ;;  %v1103_v42 = vsel %vm1012_vm3, %v1044_v20, %v2629_v29 }
  0xc6   : > { %4235 = vst [vmem:[#allocation17_spill] sm:$0xff] %v2655_v21  ;;  %v693_v10 = vadd.f32 %v2442_v1, %v653_v59  ;;  %v2670_v54 = vmul.f32 0.75, %v720_v3  ;;  %v1225_v43 = vmul.f32 0.25, %v1045_v0  ;;  %v1236_v46 = vmul.f32 0.25, %v1108_v34  ;;  %v582_v34 = vpop.f32.mrf.mxu1 }
  0xc7   : > { %v2672_v57 = vmul.f32 0.75, %v719_v7  ;;  %v2675_v4 = vmul.f32 0.75, %v2619_v24  ;;  %v2678_v11 = vmul.f32 0.75, %v2633_v32  ;;  %v1226_v47 = vmul.f32 0.25, %v1103_v42 }
  0xc8   : > { %v785_v53 = vmul.f32 0.25, %v717_v30  ;;  %v2684_v59 = vadd.f32 %v2657_v62, %v2641_v55  ;;  %v786_v20 = vmul.f32 0.25, %v718_v31  ;;  %v2690_v0 = vadd.f32 %v2659_v26, %v2655_v21 }
  0xc9   : > { %4236 = vst [vmem:[#allocation18_spill] sm:$0xff] %v2678_v11  ;;  %v663_v51 = vmul.f32 %v2432_v61, %v605_v36  ;;  %v1257_v42 = vadd.f32 %v1225_v43, %v2675_v4  ;;  %v1268_v19 = vadd.f32 %v1236_v46, %v2678_v11  ;;  %v2696_v30 = vmul.f32 0.75, %v2629_v29  ;;  %v607_v36 = vpop.f32.mrf.mxu2 }
  0xca   : > { %4237 = vst [vmem:[#allocation19_spill] sm:$0xff] %v2690_v0  ;;  %v2700_v44 = vmul.f32 0.75, %v4239_v48  ;;  %v2704_v25 = vadd.f32 %v2653_v16, %v2662_v6  ;;  %v847_v31 = vmul.f32 0.25, %v747_v63  ;;  %v2707_v49 = vadd.f32 %v786_v20, %v2670_v54 }
  0xcb   : > { %4238 = vst [vmem:[#allocation20_spill] sm:$0xff] %v2696_v30  ;;  %v2710_v43 = vadd.f32 %v785_v53, %v2672_v57  ;;  %v729_v46 = vmax.f32 %v693_v10, 0.0  ;;  %v673_v11 = vmul.f32 %v2432_v61, %v630_v52  ;;  %v1258_v48 = vadd.f32 %v1226_v47, %v2696_v30 }
  0xcc   : > { %4240 = vst [vmem:[#allocation21_spill] sm:$0xff] %v2700_v44  ;;  %1725 = vrot.lane.b32.xlu2 %v1257_v42, %s2303_s18  ;;  %1747 = vrot.lane.b32.xlu1 %v1268_v19, %s2303_s18  ;;  %v654_v33 = vmul.f32 %v2432_v61, %v582_v34  ;;  %v1424_v63 = vrot.slane %v2684_v59, 1  ;;  %v1425_v20 = vrot.slane %v2690_v0, 1  ;;  %v1058_v29 = vrot.slane %v2704_v25, 1 }
  0xcd   : > { %4241 = vst [vmem:[#allocation22_spill] sm:$0xff] %v2704_v25  ;;  %v4244_v53 = vmax.f32 %v2555_v28, 0.0  ;;  %v2722_v10 = vmul.f32 0.25, %v719_v7  ;;  %v703_v52 = vadd.f32 %v2442_v1, %v663_v51  ;;  %v664_v42 = vmul.f32 %v2432_v61, %v607_v36  ;;  %1727 = vrot.lane.b32.xlu0 %v1258_v48, %s2303_s18  ;;  %v632_v36 = vpop.f32.mrf.mxu3 }
  0xce   : > { %4242 = vst [vmem:[#allocation23_spill] sm:$0xff] %v2707_v49  ;;  %v2727_v47 = vmul.f32 0.25, %v720_v3  ;;  %v1426_v34 = vsel %vm1012_vm3, %v1424_v63, %v1425_v20  ;;  %v1060_v19 = vsel %vm1012_vm3, %v1058_v29, %v1059_v45  ;;  %v1017_v30 = vrot.slane %v2707_v49, 1 }
  0xcf   : > { %4243 = vst [vmem:[#allocation24_spill] sm:$0xff] %v2710_v43  ;;  %v848_v32 = vmul.f32 0.25, %v4244_v53  ;;  %v2732_v50 = vmul.f32 0.75, %v729_v46  ;;  %v2734_v28 = vmul.f32 0.25, %v729_v46  ;;  %v713_v7 = vadd.f32 %v2442_v1, %v673_v11 }
  0xd0   : > { %v1607_v53 = vmul.f32 0.25, %v1426_v34  ;;  %v694_v51 = vadd.f32 %v2442_v1, %v654_v33  ;;  %v2739_v48 = vmul.f32 0.75, %v2684_v59  ;;  %v1235_v3 = vmul.f32 0.25, %v1060_v19  ;;  %v585_v34 = vpop.f32.mrf.mxu1 }
  0xd1   : > { %v1016_v63 = vrot.slane %v2710_v43, 1  ;;  %v2743_v29 = vadd.f32 %v847_v31, %v2644_v56  ;;  %v739_v45 = vmax.f32 %v703_v52, 0.0  ;;  %v704_v18 = vadd.f32 %v2442_v1, %v664_v42 }
  0xd2   : > { %v2747_v46 = vmul.f32 0.75, %v2704_v25  ;;  %v2751_v11 = vadd.f32 %v2722_v10, %v2495_v40  ;;  %v2755_v33 = vadd.f32 %v2727_v47, %v2499_v41  ;;  %v1639_v19 = vadd.f32 %v1607_v53, %v2739_v48  ;;  %v562_v40 = vpop.f32.mrf.mxu0 }
  0xd3   : > { %4245 = vst [vmem:[#allocation25_spill] sm:$0xff] %v2743_v29  ;;  %v1018_v31 = vsel %vm1012_vm3, %v1016_v63, %v1017_v30  ;;  %v2760_v52 = vadd.f32 %v848_v32, %v2700_v44  ;;  %v2764_v42 = vadd.f32 %v2535_v22, %v2732_v50  ;;  %v674_v25 = vmul.f32 %v2432_v61, %v632_v36 }
  0xd4   : > { %4246 = vst [vmem:[#allocation26_spill] sm:$0xff] %v2747_v46  ;;  %v1267_v58 = vadd.f32 %v1235_v3, %v2747_v46  ;;  %v2770_v41 = vadd.f32 %v2734_v28, %v2468_v17  ;;  %v749_v15 = vmax.f32 %v713_v7, 0.0  ;;  %v730_v53 = vmax.f32 %v694_v51, 0.0  ;;  %1915 = vrot.lane.b32.xlu2 %v1639_v19, %s2303_s18 }
  0xd5   : > { %4247 = vst [vmem:[#allocation27_spill] sm:$0xff] %v2751_v11  ;;  %v645_v63 = vmul.f32 %v2432_v61, %v560_v12  ;;  %v2774_v32 = vmul.f32 0.75, %v739_v45  ;;  %v740_v44 = vmax.f32 %v704_v18, 0.0  ;;  %v2778_v22 = vmul.f32 0.75, %v2710_v43 }
  0xd6   : > { %4248 = vst [vmem:[#allocation28_spill] sm:$0xff] %v2755_v33  ;;  %1745 = vrot.lane.b32.xlu0 %v1267_v58, %s2303_s18  ;;  %v1207_v36 = vmul.f32 0.25, %v1018_v31  ;;  %v646_v3 = vmul.f32 %v2432_v61, %v562_v40  ;;  %v1486_v17 = vsel %vm1012_vm3, %v1425_v20, %v2690_v0  ;;  %v1397_v7 = vrot.slane %v2751_v11, 1  ;;  %v610_v58 = vpop.f32.mrf.mxu2 }
  0xd7   : > { %4249 = vst [vmem:[#allocation29_spill] sm:$0xff] %v2760_v52  ;;  %v4117_v12 = vrot.slane %v2755_v33, 1  ;;  %v2785_v51 = vmul.f32 0.25, %v739_v45  ;;  %v714_v19 = vadd.f32 %v2442_v1, %v674_v25  ;;  %v655_v18 = vmul.f32 %v2432_v61, %v585_v34 }
  0xd8   : > { %4250 = vst [vmem:[#allocation30_spill] sm:$0xff] %v2764_v42  ;;  %v1239_v46 = vadd.f32 %v1207_v36, %v2778_v22  ;;  %v685_v31 = vadd.f32 %v2442_v1, %v645_v63  ;;  %v1608_v43 = vmul.f32 0.25, %v1486_v17  ;;  %v1094_v40 = vsel %vm1012_vm3, %v1017_v30, %v2707_v49 }
  0xd9   : > { %4251 = vst [vmem:[#allocation31_spill] sm:$0xff] %v2778_v22  ;;  %v1399_v20 = vsel %vm1012_vm3, %v1397_v7, %v4117_v12  ;;  %v2796_v27 = vmul.f32 0.75, %v730_v53  ;;  %v2798_v45 = vmul.f32 0.75, %v740_v44  ;;  %v2802_v25 = vmul.f32 0.75, %v2690_v0 }
  0xda   : > { %1689 = vrot.lane.b32.xlu1 %v1239_v46, %s2303_s18  ;;  %v1589_v34 = vmul.f32 0.25, %v1399_v20  ;;  %v849_v36 = vmul.f32 0.25, %v749_v15  ;;  %v2804_v63 = vmul.f32 0.25, %v730_v53  ;;  %v2807_v17 = vadd.f32 %v2442_v1, %v646_v3  ;;  %v587_v20 = vpop.f32.mrf.mxu1 }
  0xdb   : > { %4252 = vst [vmem:[#allocation32_spill] sm:$0xff] %v2802_v25  ;;  %v2810_v7 = vmul.f32 0.75, %v2751_v11  ;;  %v2812_v30 = vmul.f32 0.25, %v740_v44  ;;  %v695_v12 = vadd.f32 %v2442_v1, %v655_v18  ;;  %v1640_v22 = vadd.f32 %v1608_v43, %v2802_v25 }
  0xdc   : > { %v1208_v46 = vmul.f32 0.25, %v1094_v40  ;;  %v2818_v0 = vadd.f32 %v2657_v62, %v2774_v32  ;;  %v750_v15 = vmax.f32 %v714_v19, 0.0  ;;  %v721_v53 = vmax.f32 %v685_v31, 0.0 }
  0xdd   : > { %v1621_v3 = vadd.f32 %v1589_v34, %v2810_v7  ;;  %v2823_v39 = vadd.f32 %v2537_v23, %v2796_v27  ;;  %v2827_v44 = vadd.f32 %v2659_v26, %v2798_v45  ;;  %v665_v43 = vmul.f32 %v2432_v61, %v610_v58 }
  0xde   : > { %4253 = vst [vmem:[#allocation33_spill] sm:$0xff] %v2818_v0  ;;  %1917 = vrot.lane.b32.xlu0 %v1640_v22, %s2303_s18  ;;  %v2832_v62 = vmul.f32 0.75, %v2707_v49  ;;  %v2836_v19 = vadd.f32 %v2785_v51, %v2587_v60  ;;  %v2839_v18 = vadd.f32 %v849_v36, %v2662_v6  ;;  %v722_v23 = vmax.f32 %v2807_v17, 0.0 }
  0xdf   : > { %4254 = vst [vmem:[#allocation34_spill] sm:$0xff] %v2823_v39  ;;  %v656_v31 = vmul.f32 %v2432_v61, %v587_v20  ;;  %1879 = vrot.lane.b32.xlu2 %v1621_v3, %s2303_s18  ;;  %v2846_v26 = vadd.f32 %v2804_v63, %v2490_v38  ;;  %v2850_v22 = vadd.f32 %v2812_v30, %v2592_v5  ;;  %v731_v58 = vmax.f32 %v695_v12, 0.0  ;;  %v612_v38 = vpop.f32.mrf.mxu2 }
  0xe0   : > { %4255 = vst [vmem:[#allocation35_spill] sm:$0xff] %v2832_v62  ;;  %v1240_v60 = vadd.f32 %v1208_v46, %v2832_v62  ;;  %v850_v40 = vmul.f32 0.25, %v750_v15  ;;  %v2853_v6 = vmul.f32 0.75, %v721_v53  ;;  %v1439_v34 = vrot.slane %v2743_v29, 1 }
  0xe1   : > { %4256 = vst [vmem:[#allocation36_spill] sm:$0xff] %v2836_v19  ;;  %v4127_v36 = vrot.slane %v2760_v52, 1  ;;  %v2857_v17 = vmul.f32 0.25, %v721_v53  ;;  %v705_v20 = vadd.f32 %v2442_v1, %v665_v43  ;;  %v4130_v5 = vrot.slane %v2827_v44, 1 }
  0xe2   : > { %4257 = vst [vmem:[#allocation37_spill] sm:$0xff] %v2839_v18  ;;  %1691 = vrot.lane.b32.xlu1 %v1240_v60, %s2303_s18  ;;  %v1032_v12 = vrot.slane %v2823_v39, 1  ;;  %v2863_v3 = vmul.f32 0.75, %v722_v23  ;;  %v696_v46 = vadd.f32 %v2442_v1, %v656_v31  ;;  %v666_v15 = vmul.f32 %v2432_v61, %v612_v38 }
  0xe3   : > { %4258 = vst [vmem:[#allocation38_spill] sm:$0xff] %v2846_v26  ;;  %v1441_v53 = vsel %vm1012_vm3, %v1439_v34, %v4127_v36  ;;  %v2871_v62 = vmul.f32 0.75, %v2743_v29  ;;  %v1104_v60 = vsel %vm1012_vm3, %v4130_v5, %v2827_v44  ;;  %v1031_v38 = vrot.slane %v2764_v42, 1  ;;  %v565_v34 = vpop.f32.mrf.mxu0 }
  0xe4   : > { %4259 = vst [vmem:[#allocation39_spill] sm:$0xff] %v2863_v3  ;;  %v1617_v43 = vmul.f32 0.25, %v1441_v53  ;;  %v1099_v25 = vsel %vm1012_vm3, %v1032_v12, %v2823_v39  ;;  %v1228_v49 = vmul.f32 0.25, %v1104_v60  ;;  %v2881_v18 = vmul.f32 0.75, %v731_v58  ;;  %v590_v60 = vpop.f32.mrf.mxu1 }
  0xe5   : > { %4260 = vst [vmem:[#allocation40_spill] sm:$0xff] %v2871_v62  ;;  %v1218_v31 = vmul.f32 0.25, %v1099_v25  ;;  %v2885_v53 = vmul.f32 0.75, %v2827_v44  ;;  %v2888_v29 = vmul.f32 0.75, %v2823_v39  ;;  %v2890_v5 = vmul.f32 0.25, %v731_v58 }
  0xe6   : > { %v1649_v36 = vadd.f32 %v1617_v43, %v2871_v62  ;;  %v741_v21 = vmax.f32 %v705_v20, 0.0  ;;  %v706_v25 = vadd.f32 %v2442_v1, %v666_v15  ;;  %v1033_v37 = vsel %vm1012_vm3, %v1031_v38, %v1032_v12 }
  0xe7   : > { %4261 = vst [vmem:[#allocation41_spill] sm:$0xff] %v2885_v53  ;;  %v2895_v52 = vadd.f32 %v850_v40, %v2596_v35  ;;  %v732_v2 = vmax.f32 %v696_v46, 0.0  ;;  %v1260_v43 = vadd.f32 %v1228_v49, %v2885_v53  ;;  %v1250_v62 = vadd.f32 %v1218_v31, %v2888_v29 }
  0xe8   : > { %4262 = vst [vmem:[#allocation42_spill] sm:$0xff] %v2888_v29  ;;  %1935 = vrot.lane.b32.xlu0 %v1649_v36, %s2303_s18  ;;  %v2902_v58 = vadd.f32 %v2727_v47, %v2863_v3  ;;  %v647_v20 = vmul.f32 %v2432_v61, %v565_v34  ;;  %v4264_v15 = vrot.slane %v2850_v22, 1  ;;  %v4135_v35 = vrot.slane %v2846_v26, 1 }
  0xe9   : > { %4263 = vst [vmem:[#allocation43_spill] sm:$0xff] %v2895_v52  ;;  %v2912_v40 = vadd.f32 %v2722_v10, %v2853_v6  ;;  %v2916_v49 = vadd.f32 %v2857_v17, %v2672_v57  ;;  %v657_v47 = vmul.f32 %v2432_v61, %v590_v60  ;;  %1731 = vrot.lane.b32.xlu2 %v1260_v43, %s2303_s18  ;;  %v1217_v36 = vmul.f32 0.25, %v1033_v37 }
  0xea   : > { %v1487_v12 = vsel %vm1012_vm3, %v4264_v15, %v2850_v22  ;;  %1711 = vrot.lane.b32.xlu1 %v1250_v62, %s2303_s18  ;;  %v2921_v46 = vmul.f32 0.75, %v741_v21  ;;  %v2923_v31 = vmul.f32 0.25, %v741_v21  ;;  %v742_v38 = vmax.f32 %v706_v25, 0.0 }
  0xeb   : > { %4265 = vst [vmem:[#allocation44_spill] sm:$0xff] %v2916_v49  ;;  %v1482_v10 = vsel %vm1012_vm3, %v4135_v35, %v2846_v26  ;;  %v2929_v34 = vmul.f32 0.25, %v722_v23  ;;  %v2932_v57 = vmul.f32 0.75, %v2764_v42  ;;  %v1610_v60 = vmul.f32 0.25, %v1487_v12 }
  0xec   : > { %4266 = vst [vmem:[#allocation45_spill] sm:$0xff] %v2921_v46  ;;  %v1600_v43 = vmul.f32 0.25, %v1482_v10  ;;  %v2934_v15 = vmul.f32 0.75, %v732_v2  ;;  %v2936_v37 = vmul.f32 0.25, %v732_v2  ;;  %v687_v21 = vadd.f32 %v2442_v1, %v647_v20 }
  0xed   : > { %4267 = vst [vmem:[#allocation46_spill] sm:$0xff] %v2923_v31  ;;  %v1020_v62 = vrot.slane %v2902_v58, 1  ;;  %v697_v25 = vadd.f32 %v2442_v1, %v657_v47  ;;  %v1249_v29 = vadd.f32 %v1217_v36, %v2932_v57  ;;  %v2943_v23 = vmul.f32 0.75, %v2850_v22 }
  0xee   : > { %4268 = vst [vmem:[#allocation47_spill] sm:$0xff] %v2932_v57  ;;  %v2946_v35 = vmul.f32 0.75, %v2846_v26  ;;  %v2948_v12 = vmul.f32 0.75, %v742_v38  ;;  %v4271_v2 = vrot.slane %v2755_v33, 1  ;;  %v1046_v20 = vrot.slane %v2818_v0, 1 }
  0xef   : > { %v1019_v42 = vrot.slane %v2912_v40, 1  ;;  %v2958_v47 = vadd.f32 %v2734_v28, %v2881_v18  ;;  %v2960_v36 = vmul.f32 0.25, %v742_v38  ;;  %v1642_v57 = vadd.f32 %v1610_v60, %v2943_v23 }
  0xf0   : > { %4269 = vst [vmem:[#allocation48_spill] sm:$0xff] %v2946_v35  ;;  %v1477_v10 = vsel %vm1012_vm3, %v4271_v2, %v2755_v33  ;;  %1709 = vrot.lane.b32.xlu0 %v1249_v29, %s2303_s18  ;;  %v1632_v39 = vadd.f32 %v1600_v43, %v2946_v35  ;;  %v2967_v52 = vadd.f32 %v2890_v5, %v2732_v50  ;;  %v723_v2 = vmax.f32 %v687_v21, 0.0  ;;  %v615_v50 = vpop.f32.mrf.mxu2  ;;  %v567_v43 = vpop.f32.mrf.mxu0 }
  0xf1   : > { %4270 = vst [vmem:[#allocation49_spill] sm:$0xff] %v2948_v12  ;;  %v4275_v53 = vrot.slane %v2827_v44, 1  ;;  %v1021_v28 = vsel %vm1012_vm3, %v1019_v42, %v1020_v62  ;;  %v2975_v38 = vadd.f32 %v2785_v51, %v2921_v46  ;;  %v2979_v29 = vadd.f32 %v2923_v31, %v2774_v32  ;;  %1921 = vrot.lane.b32.xlu2 %v1642_v57, %s2303_s18 }
  0xf2   : > { %4272 = vst [vmem:[#allocation50_spill] sm:$0xff] %v2958_v47  ;;  %v2983_v60 = vadd.f32 %v2929_v34, %v2670_v54  ;;  %1901 = vrot.lane.b32.xlu1 %v1632_v39, %s2303_s18  ;;  %v2989_v42 = vadd.f32 %v2804_v63, %v2934_v15  ;;  %v2993_v51 = vadd.f32 %v2936_v37, %v2796_v27  ;;  %v733_v54 = vmax.f32 %v697_v25, 0.0  ;;  %v592_v39 = vpop.f32.mrf.mxu1 }
  0xf3   : > { %4273 = vst [vmem:[#allocation51_spill] sm:$0xff] %v2960_v36  ;;  %v1048_v3 = vsel %vm1012_vm3, %v1046_v20, %v4275_v53  ;;  %v1590_v53 = vmul.f32 0.25, %v1477_v10  ;;  %v2997_v32 = vadd.f32 %v2812_v30, %v2948_v12  ;;  %v3001_v57 = vadd.f32 %v2960_v36, %v2798_v45 }
  0xf4   : > { %4274 = vst [vmem:[#allocation52_spill] sm:$0xff] %v2967_v52  ;;  %v3004_v21 = vmul.f32 0.75, %v2755_v33  ;;  %v1227_v63 = vmul.f32 0.25, %v1048_v3  ;;  %v1209_v10 = vmul.f32 0.25, %v1021_v28  ;;  %v757_v20 = vmul.f32 0.75, %v723_v2 }
  0xf5   : > { %4276 = vst [vmem:[#allocation53_spill] sm:$0xff] %v2975_v38  ;;  %v791_v35 = vmul.f32 0.25, %v723_v2  ;;  %v667_v27 = vmul.f32 %v2432_v61, %v615_v50  ;;  %v1412_v46 = vrot.slane %v2770_v41, 1  ;;  %v648_v30 = vmul.f32 %v2432_v61, %v567_v43 }
  0xf6   : > { %4277 = vst [vmem:[#allocation54_spill] sm:$0xff] %v2979_v29  ;;  %v1622_v25 = vadd.f32 %v1590_v53, %v3004_v21  ;;  %v3011_v12 = vmul.f32 0.75, %v2818_v0  ;;  %v3014_v45 = vmul.f32 0.75, %v2912_v40  ;;  %v801_v33 = vmul.f32 0.25, %v733_v54 }
  0xf7   : > { %4278 = vst [vmem:[#allocation55_spill] sm:$0xff] %v2983_v60  ;;  %v658_v3 = vmul.f32 %v2432_v61, %v592_v39  ;;  %v4285_v28 = vrot.slane %v2846_v26, 1  ;;  %v1427_v50 = vrot.slane %v2836_v19, 1  ;;  %v3022_v36 = vadd.f32 %v2857_v17, %v757_v20 }
  0xf8   : > { %4279 = vst [vmem:[#allocation56_spill] sm:$0xff] %v2989_v42  ;;  %v767_v43 = vmul.f32 0.75, %v733_v54  ;;  %1881 = vrot.lane.b32.xlu0 %v1622_v25, %s2303_s18  ;;  %v1259_v53 = vadd.f32 %v1227_v63, %v3011_v12  ;;  %v3028_v31 = vadd.f32 %v791_v35, %v2531_v9  ;;  %v707_v39 = vadd.f32 %v2442_v1, %v667_v27 }
  0xf9   : > { %4280 = vst [vmem:[#allocation57_spill] sm:$0xff] %v2993_v51  ;;  %v1414_v2 = vsel %vm1012_vm3, %v1412_v46, %v4285_v28  ;;  %v4288_v26 = vrot.slane %v2850_v22, 1  ;;  %v1095_v17 = vsel %vm1012_vm3, %v1020_v62, %v2902_v58  ;;  %v3037_v54 = vadd.f32 %v791_v35, %v2853_v6  ;;  %v617_v35 = vpop.f32.mrf.mxu2 }
  0xfa   : > { %4281 = vst [vmem:[#allocation58_spill] sm:$0xff] %v2997_v32  ;;  %v3040_v25 = vadd.f32 %v2460_v14, %v757_v20  ;;  %v688_v63 = vadd.f32 %v2442_v1, %v648_v30  ;;  %1729 = vrot.lane.b32.xlu1 %v1259_v53, %s2303_s18  ;;  %v1599_v9 = vmul.f32 0.25, %v1414_v2  ;;  %v698_v62 = vadd.f32 %v2442_v1, %v658_v3 }
  0xfb   : > { %4282 = vst [vmem:[#allocation59_spill] sm:$0xff] %v3001_v57  ;;  %v1429_v46 = vsel %vm1012_vm3, %v1427_v50, %v4288_v26  ;;  %v3049_v26 = vadd.f32 %v801_v33, %v2641_v55  ;;  %v1035_v6 = vrot.slane %v2989_v42, 1  ;;  %v3054_v14 = vadd.f32 %v801_v33, %v2881_v18 }
  0xfc   : > { %4283 = vst [vmem:[#allocation60_spill] sm:$0xff] %v3004_v21  ;;  %v1241_v21 = vadd.f32 %v1209_v10, %v3014_v45  ;;  %v3046_v10 = vadd.f32 %v2890_v5, %v767_v43  ;;  %v3057_v20 = vmul.f32 0.75, %v2770_v41  ;;  %v1609_v27 = vmul.f32 0.25, %v1429_v46 }
  0xfd   : > { %4284 = vst [vmem:[#allocation61_spill] sm:$0xff] %v3011_v12  ;;  %v3060_v30 = vadd.f32 %v2601_v13, %v767_v43  ;;  %v743_v5 = vmax.f32 %v707_v39, 0.0  ;;  %v1401_v55 = vrot.slane %v2983_v60, 1  ;;  %v1034_v28 = vrot.slane %v2958_v47, 1 }
  0xfe   : > { %4286 = vst [vmem:[#allocation62_spill] sm:$0xff] %v3022_v36  ;;  %1693 = vrot.lane.b32.xlu2 %v1241_v21, %s2303_s18  ;;  %v1210_v21 = vmul.f32 0.25, %v1095_v17  ;;  %v724_v3 = vmax.f32 %v688_v63, 0.0  ;;  %v1631_v2 = vadd.f32 %v1599_v9, %v3057_v20  ;;  %v3066_v33 = vmul.f32 0.75, %v2836_v19 }
  0xff   : > { %4287 = vst [vmem:[#allocation63_spill] sm:$0xff] %v3028_v31  ;;  %v3069_v18 = vmul.f32 0.75, %v2902_v58  ;;  %v734_v50 = vmax.f32 %v698_v62, 0.0  ;;  %v668_v53 = vmul.f32 %v2432_v61, %v617_v35  ;;  %v1100_v13 = vsel %vm1012_vm3, %v1035_v6, %v2989_v42 }
 0x100   : > { %4289 = vst [vmem:[#allocation64_spill] sm:$0xff] %v3046_v10  ;;  %v1400_v43 = vrot.slane %v2916_v49, 1  ;;  %1899 = vrot.lane.b32.xlu0 %v1631_v2, %s2303_s18  ;;  %v1641_v39 = vadd.f32 %v1609_v27, %v3066_v33  ;;  %v4154_v17 = vrot.slane %v2619_v24, 7  ;;  %v4159_v63 = vrot.slane %v2684_v59, 7 }
 0x101   : > { %4290 = vst [vmem:[#allocation65_spill] sm:$0xff] %v3057_v20  ;;  %v1242_v46 = vadd.f32 %v1210_v21, %v3069_v18  ;;  %v3080_v9 = vmul.f32 0.75, %v743_v5  ;;  %v3082_v62 = vmul.f32 0.25, %v743_v5  ;;  %v1036_v35 = vsel %vm1012_vm3, %v1034_v28, %v1035_v6 }
 0x102   : > { %4291 = vst [vmem:[#allocation66_spill] sm:$0xff] %v3066_v33  ;;  %v1402_v61 = vsel %vm1012_vm3, %v1400_v43, %v1401_v55  ;;  %v758_v20 = vmul.f32 0.75, %v724_v3  ;;  %v792_v12 = vmul.f32 0.25, %v724_v3  ;;  %1919 = vrot.lane.b32.xlu1 %v1641_v39, %s2303_s18  ;;  %v3089_v27 = vmul.f32 0.75, %v2989_v42 }
 0x103   : > { %v1220_v21 = vmul.f32 0.25, %v1100_v13  ;;  %v3092_v2 = vmul.f32 0.75, %v2958_v47  ;;  %v1006_v6 = vsel %vm915_vm2, %v2619_v24, %v4154_v17  ;;  %v1390_v28 = vsel %vm915_vm2, %v2684_v59, %v4159_v63 }
 0x104   : > { %4292 = vst [vmem:[#allocation67_spill] sm:$0xff] %v3089_v27  ;;  %v1591_v3 = vmul.f32 0.25, %v1402_v61  ;;  %v1219_v43 = vmul.f32 0.25, %v1036_v35  ;;  %v1050_v13 = vrot.slane %v2997_v32, 1  ;;  %v1161_v39 = vmul.f32 0.25, %v1006_v6 }
 0x105   : > { %4293 = vst [vmem:[#allocation68_spill] sm:$0xff] %v3092_v2  ;;  %v3108_v5 = vmul.f32 0.75, %v734_v50  ;;  %v3110_v33 = vmul.f32 0.25, %v734_v50  ;;  %v1543_v17 = vmul.f32 0.25, %v1390_v28  ;;  %v1252_v42 = vadd.f32 %v1220_v21, %v3089_v27 }
 0x106   : > { %1695 = vrot.lane.b32.xlu2 %v1242_v46, %s2303_s18  ;;  %v3106_v46 = vadd.f32 %v3082_v62, %v2644_v56  ;;  %v3114_v47 = vmul.f32 0.75, %v2916_v49  ;;  %v3117_v61 = vadd.f32 %v1161_v39, %v2675_v4  ;;  %v4158_v35 = vrot.slane %v2751_v11, 7 }
 0x107   : > { %v3122_v6 = vadd.f32 %v2653_v16, %v3080_v9  ;;  %v3125_v56 = vadd.f32 %v2929_v34, %v758_v20  ;;  %v4296_v50 = vrot.slane %v2993_v51, 1  ;;  %v3132_v28 = vadd.f32 %v1543_v17, %v2739_v48 }
 0x108   : > { %4294 = vst [vmem:[#allocation69_spill] sm:$0xff] %v3114_v47  ;;  %1715 = vrot.lane.b32.xlu0 %v1252_v42, %s2303_s18  ;;  %v1623_v4 = vadd.f32 %v1591_v3, %v3114_v47  ;;  %v1251_v39 = vadd.f32 %v1219_v43, %v3092_v2  ;;  %v1105_v16 = vsel %vm1012_vm3, %v1050_v13, %v2997_v32  ;;  %v3153_v3 = vmul.f32 0.75, %v2993_v51  ;;  %v4302_v2 = vld [vmem:[#allocation2_spill] sm:$0xff] }
 0x109   : > { %4295 = vst [vmem:[#allocation70_spill] sm:$0xff] %v3125_v56  ;;  %v1483_v21 = vsel %vm1012_vm3, %v4296_v50, %v2993_v51  ;;  %v1381_v34 = vsel %vm915_vm2, %v2751_v11, %v4158_v35  ;;  %v3145_v50 = vadd.f32 %v792_v12, %v2549_v8  ;;  %v708_v48 = vadd.f32 %v2442_v1, %v668_v53 }
 0x10a   : > { %v1478_v42 = vsel %vm1012_vm3, %v1401_v55, %v2983_v60  ;;  %v1525_v17 = vmul.f32 0.25, %v1381_v34  ;;  %1883 = vrot.lane.b32.xlu1 %v1623_v4, %s2303_s18  ;;  %4298 = vst [vmem:[#allocation72_spill] sm:$0xff] %v3153_v3  ;;  %v1602_v43 = vmul.f32 0.25, %v1483_v21  ;;  %v950_v35 = vrot.slane %v2827_v44, 7  ;;  %v4300_v34 = vld [vmem:[#allocation39_spill] sm:$0xff] }
 0x10b   : > { %4297 = vst [vmem:[#allocation71_spill] sm:$0xff] %v3145_v50  ;;  %v3162_v1 = vmul.f32 0.75, %v2997_v32  ;;  %v1230_v8 = vmul.f32 0.25, %v1105_v16  ;;  %v1049_v55 = vrot.slane %v2975_v38, 1  ;;  %v1592_v53 = vmul.f32 0.25, %v1478_v42  ;;  %v4301_v32 = vld [vmem:[#allocation6_spill] sm:$0xff] }
 0x10c   : > { %v1431_v4 = vrot.slane %v3001_v57, 1  ;;  %v4167_v44 = vrot.slane %v2818_v0, 7  ;;  %v3171_v63 = vadd.f32 %v792_v12, %v4300_v34  ;;  %v744_v47 = vmax.f32 %v708_v48, 0.0  ;;  %v4305_v48 = vld [vmem:[#allocation17_spill] sm:$0xff]  ;;  %v4345_v0 = vld [vmem:[#allocation14_spill] sm:$0xff] }
 0x10d   : > { %4299 = vst [vmem:[#allocation73_spill] sm:$0xff] %v3162_v1  ;;  %v1415_v27 = vrot.slane %v2967_v52, 1  ;;  %v3177_v49 = vadd.f32 %v4302_v2, %v758_v20  ;;  %v1634_v42 = vadd.f32 %v1602_v43, %v3153_v3  ;;  %v3181_v11 = vmul.f32 0.75, %v2983_v60 }
 0x10e   : > { %1713 = vrot.lane.b32.xlu2 %v1251_v39, %s2303_s18  ;;  %v3167_v39 = vadd.f32 %v1525_v17, %v2810_v7  ;;  %v951_v7 = vsel %vm915_vm2, %v4167_v44, %v950_v35  ;;  %v3190_v12 = vadd.f32 %v2936_v37, %v3108_v5  ;;  %v1262_v20 = vadd.f32 %v1230_v8, %v3162_v1  ;;  %v4306_v35 = vld [vmem:[#allocation8_spill] sm:$0xff] }
 0x10f   : > { %4303 = vst [vmem:[#allocation39_spill] sm:$0xff] %v3181_v11  ;;  %v1051_v2 = vsel %vm1012_vm3, %v1049_v55, %v1050_v13  ;;  %v1624_v17 = vadd.f32 %v1592_v53, %v3181_v11  ;;  %v1488_v43 = vsel %vm1012_vm3, %v1431_v4, %v3001_v57  ;;  %v1164_v34 = vmul.f32 0.25, %v951_v7 }
 0x110   : > { %4304 = vst [vmem:[#allocation6_spill] sm:$0xff] %v3190_v12  ;;  %1905 = vrot.lane.b32.xlu0 %v1634_v42, %s2303_s18  ;;  %v3203_v37 = vmul.f32 0.25, %v744_v47  ;;  %v1332_v13 = vrot.slane %v2850_v22, 7  ;;  %v1229_v55 = vmul.f32 0.25, %v1051_v2  ;;  %v1430_v53 = vrot.slane %v2979_v29, 1  ;;  %v4309_v42 = vld [vmem:[#allocation7_spill] sm:$0xff] }
 0x111   : > { %v1313_v7 = vrot.slane %v4309_v42, 7  ;;  %v3218_v44 = vmul.f32 0.75, %v3001_v57  ;;  %v1612_v1 = vmul.f32 0.25, %v1488_v43  ;;  %v3221_v3 = vmul.f32 0.75, %v2967_v52 }
 0x112   : > { %1735 = vrot.lane.b32.xlu1 %v1262_v20, %s2303_s18  ;;  %v1023_v57 = vrot.slane %v3125_v56, 1  ;;  %v3236_v22 = vadd.f32 %v3110_v33, %v2934_v15 }
 0x113   : > { %4310 = vst [vmem:[#allocation17_spill] sm:$0xff] %v3218_v44 }
 0x114   : > { %4311 = vst [vmem:[#allocation8_spill] sm:$0xff] %v3221_v3 }
 0x116   : > { %v1708_v21 = vpop.permute.xlu2 %1707  ;;  %1885 = vrot.lane.b32.xlu2 %v1624_v17, %s2303_s18  ;;  %v4312_v17 = vld [vmem:[#allocation41_spill] sm:$0xff] }
 0x117   : > { %v1793_v16 = vsel %vm1781_vm4, %v4301_v32, %v1708_v21  ;;  %v3194_v32 = vadd.f32 %v3110_v33, %v4305_v48  ;;  %v1314_v21 = vrot.slane %v4306_v35, 7  ;;  %v4308_v48 = vrot.slane %v2993_v51, 1 }
 0x118   : > { %1826 = vst.msk [vmem:[%s3159_s25 + $0xa8] sm:$0xff] %vm1814_vm5, %v1793_v16  ;;  %v3206_v16 = vmul.f32 0.75, %v2975_v38  ;;  %v4174_v35 = vrot.slane %v2836_v19, 7  ;;  %v3226_v2 = vadd.f32 %v1164_v34, %v4312_v17  ;;  %v1025_v38 = vrot.slane %v3028_v31, 1 }
 0x119   : > { %v1417_v8 = vsel %vm1012_vm3, %v1415_v27, %v4308_v48  ;;  %v1315_v20 = vsel %vm915_vm2, %v1313_v7, %v1314_v21  ;;  %v1432_v34 = vsel %vm1012_vm3, %v1430_v53, %v1431_v4  ;;  %v4313_v17 = vrot.slane %v3145_v50, 1 }
 0x11a   : > { %4307 = vst [vmem:[#allocation2_spill] sm:$0xff] %v3206_v16  ;;  %v1601_v27 = vmul.f32 0.25, %v1417_v8  ;;  %v1333_v48 = vsel %vm915_vm2, %v4174_v35, %v1332_v13  ;;  %v3238_v8 = vmul.f32 0.75, %v744_v47  ;;  %v1261_v21 = vadd.f32 %v1229_v55, %v3206_v16  ;;  %v4315_v55 = vld [vmem:[#allocation21_spill] sm:$0xff] }
 0x11b   : > { %v1546_v51 = vmul.f32 0.25, %v1333_v48  ;;  %v1027_v13 = vsel %vm1012_vm3, %v1025_v38, %v4313_v17  ;;  %v1534_v35 = vmul.f32 0.25, %v1315_v20  ;;  %v1040_v19 = vrot.slane %v3049_v26, 1  ;;  %v4314_v48 = vld [vmem:[#allocation10_spill] sm:$0xff]  ;;  %v4318_v17 = vld [vmem:[#allocation11_spill] sm:$0xff] }
 0x11c   : > { %v3251_v15 = vadd.f32 %v4314_v48, %v3108_v5  ;;  %1733 = vrot.lane.b32.xlu0 %v1261_v21, %s2303_s18  ;;  %v1644_v47 = vadd.f32 %v1612_v1, %v3218_v44  ;;  %v1633_v33 = vadd.f32 %v1601_v27, %v3221_v3  ;;  %v1038_v4 = vrot.slane %v3190_v12, 1  ;;  %v4320_v44 = vld [vmem:[#allocation12_spill] sm:$0xff] }
 0x11d   : > { %v3247_v43 = vadd.f32 %v1546_v51, %v2943_v23  ;;  %v3259_v38 = vadd.f32 %v3203_v37, %v4315_v55  ;;  %v3262_v53 = vmul.f32 0.75, %v2979_v29  ;;  %v1096_v23 = vsel %vm1012_vm3, %v1023_v57, %v3125_v56 }
 0x11e   : > { %v4317_v51 = vrot.slane %v3194_v32, 1  ;;  %1925 = vrot.lane.b32.xlu1 %v1644_v47, %s2303_s18  ;;  %1903 = vrot.lane.b32.xlu2 %v1633_v33, %s2303_s18  ;;  %v1611_v1 = vmul.f32 0.25, %v1432_v34  ;;  %v1213_v27 = vmul.f32 0.25, %v1027_v13  ;;  %v3272_v20 = vmul.f32 0.75, %v3049_v26  ;;  %v1898_v13 = vpop.permute.xlu2 %1897 }
 0x11f   : > { %4316 = vst [vmem:[#allocation7_spill] sm:$0xff] %v3262_v53  ;;  %v3276_v48 = vadd.f32 %v4318_v17, %v3238_v8  ;;  %v3279_v55 = vmul.f32 0.75, %v3028_v31  ;;  %v1022_v47 = vrot.slane %v3022_v36, 1  ;;  %v3284_v33 = vmul.f32 0.75, %v3125_v56 }
 0x120   : > { %v1042_v5 = vsel %vm1012_vm3, %v1040_v19, %v4317_v51  ;;  %v1566_v19 = vadd.f32 %v1534_v35, %v4320_v44  ;;  %v1212_v34 = vmul.f32 0.25, %v1096_v23  ;;  %v1101_v51 = vsel %vm1012_vm3, %v1038_v4, %v3190_v12 }
 0x121   : > { %v1223_v21 = vmul.f32 0.25, %v1042_v5  ;;  %4319 = vst [vmem:[#allocation41_spill] sm:$0xff] %v3279_v55  ;;  %v1037_v16 = vrot.slane %v3046_v10, 1  ;;  %v1385_v44 = vsel %vm915_vm2, %v4309_v42, %v1313_v7  ;;  %v1643_v56 = vadd.f32 %v1611_v1, %v3262_v53 }
 0x122   : > { %4321 = vst [vmem:[#allocation10_spill] sm:$0xff] %v3284_v33  ;;  %v1984_v17 = vsel %vm1781_vm4, %v1566_v19, %v1898_v13  ;;  %v1245_v23 = vadd.f32 %v1213_v27, %v3279_v55  ;;  %v3301_v29 = vmul.f32 0.75, %v3190_v12  ;;  %v1222_v31 = vmul.f32 0.25, %v1101_v51 }
 0x123   : > { %v3289_v5 = vadd.f32 %v1223_v21, %v3272_v20  ;;  %2218 = vst.msk [vmem:[%s3159_s25 + $0x98] sm:$0xff] %vm1814_vm5, %v1984_v17  ;;  %v4323_v21 = vld [vmem:[#allocation5_spill] sm:$0xff]  ;;  %v1024_v19 = vsel %vm1012_vm3, %v1022_v47, %v1023_v57  ;;  %v4190_v13 = vrot.slane %v3177_v49, 1  ;;  %v4192_v42 = vrot.slane %v3251_v15, 1  ;;  %v4324_v17 = vld [vmem:[#allocation22_spill] sm:$0xff] }
 0x124   : > { %4322 = vst [vmem:[#allocation21_spill] sm:$0xff] %v3301_v29  ;;  %1923 = vrot.lane.b32.xlu0 %v1643_v56, %s2303_s18  ;;  %v1244_v7 = vadd.f32 %v1212_v34, %v3284_v33  ;;  %v4193_v1 = vrot.slane %v3171_v63, 1  ;;  %v3310_v27 = vmul.f32 0.25, %v1385_v44  ;;  %v1039_v53 = vsel %vm1012_vm3, %v1037_v16, %v1038_v4 }
 0x125   : > { %v1406_v51 = vrot.slane %v3040_v25, 1  ;;  %v1421_v57 = vrot.slane %v3060_v30, 1  ;;  %v4325_v47 = vrot.slane %v2912_v40, 7  ;;  %v3323_v56 = vmul.f32 0.75, %v3046_v10 }
 0x126   : > { %1701 = vrot.lane.b32.xlu2 %v1245_v23, %s2303_s18  ;;  %1699 = vrot.lane.b32.xlu1 %v1244_v7, %s2303_s18  ;;  %v3326_v34 = vmul.f32 0.75, %v3022_v36  ;;  %v1211_v16 = vmul.f32 0.25, %v1024_v19  ;;  %v1403_v4 = vrot.slane %v3037_v54, 1  ;;  %v3333_v35 = vmul.f32 0.75, %v3037_v54 }
 0x127   : > { %v998_v3 = vsel %vm915_vm2, %v2912_v40, %v4325_v47  ;;  %4326 = vst [vmem:[#allocation11_spill] sm:$0xff] %v3323_v56  ;;  %v1408_v44 = vsel %vm1012_vm3, %v1406_v51, %v4190_v13  ;;  %v1423_v23 = vsel %vm1012_vm3, %v1421_v57, %v4192_v42  ;;  %v1221_v47 = vmul.f32 0.25, %v1039_v53  ;;  %v1726_v53 = vpop.permute.xlu2 %1725  ;;  %v4329_v42 = vld [vmem:[#allocation15_spill] sm:$0xff] }
 0x128   : > { %4327 = vst [vmem:[#allocation12_spill] sm:$0xff] %v3326_v34  ;;  %v1145_v7 = vmul.f32 0.25, %v998_v3  ;;  %v1405_v33 = vsel %vm1012_vm3, %v1403_v4, %v4193_v1  ;;  %v3342_v19 = vmul.f32 0.75, %v3060_v30  ;;  %v1605_v36 = vmul.f32 0.25, %v1423_v23 }
 0x129   : > { %v1254_v55 = vadd.f32 %v1222_v31, %v3301_v29  ;;  %v1593_v51 = vmul.f32 0.25, %v1405_v33  ;;  %v4197_v13 = vrot.slane %v3259_v38, 1  ;;  %v1243_v3 = vadd.f32 %v1211_v16, %v3326_v34 }
 0x12a   : > { %4328 = vst [vmem:[#allocation5_spill] sm:$0xff] %v3342_v19  ;;  %v3347_v12 = vadd.f32 %v1145_v7, %v3014_v45  ;;  %v1595_v57 = vmul.f32 0.25, %v1408_v44  ;;  %v962_v4 = vrot.slane %v4329_v42, 7  ;;  %v3352_v1 = vadd.f32 %v1605_v36, %v3342_v19  ;;  %v4332_v42 = vld [vmem:[#allocation4_spill] sm:$0xff]  ;;  %v4358_v19 = vld [vmem:[#allocation19_spill] sm:$0xff] }
 0x12b   : > { %v1802_v31 = vsel %vm1781_vm4, %v3117_v61, %v1726_v53  ;;  %v4330_v33 = vrot.slane %v3145_v50, 1  ;;  %v3361_v7 = vadd.f32 %v1593_v51, %v3333_v35  ;;  %v1055_v16 = vrot.slane %v3106_v46, 1 }
 0x12c   : > { %v1253_v44 = vadd.f32 %v1221_v47, %v3323_v56  ;;  %1697 = vrot.lane.b32.xlu0 %v1243_v3, %s2303_s18  ;;  %1835 = vst.msk [vmem:[%s3159_s25 + $0x140] sm:$0xff] %vm1814_vm5, %v1802_v31  ;;  %v4331_v36 = vrot.slane %v3194_v32, 1  ;;  %v3376_v51 = vmul.f32 0.75, %v3145_v50  ;;  %v4334_v3 = vld [vmem:[#allocation37_spill] sm:$0xff]  ;;  %v4335_v56 = vld [vmem:[#allocation43_spill] sm:$0xff] }
 0x12d   : > { %v1097_v23 = vsel %vm1012_vm3, %v4330_v33, %v3145_v50  ;;  %v923_v33 = vrot.slane %v2902_v58, 7  ;;  %v1057_v47 = vsel %vm1012_vm3, %v1055_v16, %v4197_v13  ;;  %v1442_v31 = vrot.slane %v4334_v3, 1 }
 0x12e   : > { %v1706_v45 = vpop.permute.xlu1 %1705  ;;  %v1102_v61 = vsel %vm1012_vm3, %v4331_v36, %v3194_v32  ;;  %4333 = vst [vmem:[#allocation22_spill] sm:$0xff] %v3376_v51  ;;  %v4199_v34 = vrot.slane %v4335_v56, 1  ;;  %1719 = vrot.lane.b32.xlu2 %v1254_v55, %s2303_s18  ;;  %1717 = vrot.lane.b32.xlu1 %v1253_v44, %s2303_s18  ;;  %v3388_v58 = vmul.f32 0.75, %v3106_v46  ;;  %v1233_v36 = vmul.f32 0.25, %v1057_v47 }
 0x12f   : > { %v1792_v53 = vsel %vm1781_vm4, %v4332_v42, %v1706_v45  ;;  %v1214_v45 = vmul.f32 0.25, %v1097_v23  ;;  %v4337_v42 = vrot.slane %v2912_v40, 7  ;;  %v1224_v50 = vmul.f32 0.25, %v1102_v61  ;;  %v1686_v47 = vpop.permute.xlu0 %1685  ;;  %v1916_v52 = vpop.permute.xlu2 %1915 }
 0x130   : > { %1825 = vst.msk [vmem:[%s3159_s25 + $0xa0] sm:$0xff] %vm1814_vm5, %v1792_v53  ;;  %v1436_v16 = vrot.slane %v3122_v6, 1  ;;  %v1444_v29 = vsel %vm1012_vm3, %v1442_v31, %v4199_v34  ;;  %v3398_v55 = vadd.f32 %v1233_v36, %v3388_v58  ;;  %v4208_v23 = vrot.slane %v3276_v48, 1 }
 0x131   : > { %4336 = vst [vmem:[#allocation15_spill] sm:$0xff] %v3388_v58  ;;  %v924_v53 = vsel %vm915_vm2, %v4337_v42, %v923_v33  ;;  %v3402_v44 = vmul.f32 0.75, %v4334_v3  ;;  %v1619_v40 = vmul.f32 0.25, %v1444_v29  ;;  %v3405_v33 = vmul.f32 0.75, %v3040_v25 }
 0x132   : > { %v1146_v13 = vmul.f32 0.25, %v924_v53  ;;  %v3408_v61 = vmul.f32 0.75, %v3194_v32  ;;  %v1419_v42 = vrot.slane %v3236_v22, 1  ;;  %v1246_v36 = vadd.f32 %v1214_v45, %v3376_v51  ;;  %v4339_v53 = vld [vmem:[#allocation9_spill] sm:$0xff] }
 0x133   : > { %v1782_v34 = vsel %vm1781_vm4, %v4339_v53, %v1686_v47  ;;  %v1438_v29 = vsel %vm1012_vm3, %v1436_v16, %v4208_v23  ;;  %v3421_v10 = vadd.f32 %v1619_v40, %v3402_v44  ;;  %v1627_v11 = vadd.f32 %v1595_v57, %v3405_v33 }
 0x134   : > { %v3412_v31 = vadd.f32 %v1146_v13, %v3069_v18  ;;  %1815 = vst.msk [vmem:[%s3159_s25] sm:$0xff] %vm1814_vm5, %v1782_v34  ;;  %v4341_v18 = vrot.slane %v4323_v21, 7  ;;  %v4342_v13 = vld [vmem:[#allocation3_spill] sm:$0xff]  ;;  %v4344_v47 = vrot.slane %v4324_v17, 7  ;;  %v947_v16 = vrot.slane %v4345_v0, 7  ;;  %1703 = vrot.lane.b32.xlu0 %v1246_v36, %s2303_s18 }
 0x135   : > { %4340 = vst [vmem:[#allocation37_spill] sm:$0xff] %v3421_v10  ;;  %v4343_v45 = vrot.slane %v4342_v13, 7  ;;  %v1256_v40 = vadd.f32 %v1224_v50, %v3408_v61  ;;  %v1993_v57 = vsel %vm1781_vm4, %v3132_v28, %v1916_v52  ;;  %v3440_v34 = vmul.f32 0.75, %v3122_v6  ;;  %v4347_v13 = vld [vmem:[#allocation46_spill] sm:$0xff]  ;;  %v4351_v50 = vld [vmem:[#allocation24_spill] sm:$0xff]  ;;  %v4356_v10 = vld [vmem:[#allocation45_spill] sm:$0xff] }
 0x136   : > { %4338 = vst [vmem:[#allocation4_spill] sm:$0xff] %v3412_v31  ;;  %v963_v53 = vsel %vm915_vm2, %v4344_v47, %v962_v4  ;;  %v1615_v21 = vmul.f32 0.25, %v1438_v29  ;;  %v1484_v0 = vsel %vm1012_vm3, %v1419_v42, %v3236_v22  ;;  %v4350_v52 = vrot.slane %v3171_v63, 1  ;;  %1891 = vrot.lane.b32.xlu2 %v1627_v11, %s2303_s18  ;;  %v4352_v29 = vld [vmem:[#allocation13_spill] sm:$0xff] }
 0x137   : > { %v918_v51 = vsel %vm915_vm2, %v4343_v45, %v4341_v18  ;;  %4346 = vst [vmem:[#allocation43_spill] sm:$0xff] %v3440_v34  ;;  %v3444_v18 = vadd.f32 %v4347_v13, %v3080_v9  ;;  %v4349_v45 = vld [vmem:[#allocation51_spill] sm:$0xff]  ;;  %1723 = vrot.lane.b32.xlu1 %v1256_v40, %s2303_s18  ;;  %v919_v36 = vrot.slane %v4351_v50, 7  ;;  %v1565_v47 = vadd.f32 %v3310_v27, %v4352_v29  ;;  %v1896_v27 = vpop.permute.xlu1 %1895 }
 0x138   : > { %v3448_v4 = vadd.f32 %v4349_v45, %v3238_v8  ;;  %2227 = vst.msk [vmem:[%s3159_s25 + $0x130] sm:$0xff] %vm1814_vm5, %v1993_v57  ;;  %v1479_v28 = vsel %vm1012_vm3, %v4350_v52, %v3171_v63  ;;  %v1142_v9 = vmul.f32 0.25, %v918_v51  ;;  %v3462_v8 = vadd.f32 %v1615_v21, %v3440_v34 }
 0x139   : > { %4348 = vst [vmem:[#allocation9_spill] sm:$0xff] %v3444_v18  ;;  %v1172_v57 = vmul.f32 0.25, %v963_v53  ;;  %v4353_v13 = vrot.slane %v2619_v24, 7  ;;  %v4354_v52 = vrot.slane %v4324_v17, 7  ;;  %v3474_v51 = vmul.f32 0.75, %v3236_v22  ;;  %v1688_v24 = vpop.permute.xlu0 %1687 }
 0x13a   : > { %v1604_v40 = vmul.f32 0.25, %v1484_v0  ;;  %v3477_v21 = vmul.f32 0.75, %v3171_v63  ;;  %v1594_v23 = vmul.f32 0.25, %v1479_v28  ;;  %v1052_v53 = vrot.slane %v3444_v18, 1  ;;  %v4357_v28 = vld [vmem:[#allocation49_spill] sm:$0xff] }
 0x13b   : > { %v948_v45 = vsel %vm915_vm2, %v4353_v13, %v947_v16  ;;  %v1011_v11 = vsel %vm915_vm2, %v4324_v17, %v4354_v52  ;;  %v1418_v16 = vrot.slane %v3054_v14, 1  ;;  %v1983_v29 = vsel %vm1781_vm4, %v1565_v47, %v1896_v27  ;;  %v4355_v13 = vld [vmem:[#allocation16_spill] sm:$0xff] }
 0x13c   : > { %v1174_v17 = vadd.f32 %v1142_v9, %v4355_v13  ;;  %v1162_v52 = vmul.f32 0.25, %v948_v45  ;;  %v997_v0 = vsel %vm915_vm2, %v4351_v50, %v919_v36  ;;  %v3488_v34 = vadd.f32 %v3082_v62, %v4356_v10  ;;  %2217 = vst.msk [vmem:[%s3159_s25 + $0x90] sm:$0xff] %vm1814_vm5, %v1983_v29  ;;  %1721 = vrot.lane.b32.xlu0 %v3289_v5, %s2303_s18  ;;  %v4359_v62 = vld [vmem:[#allocation18_spill] sm:$0xff]  ;;  %v4361_v29 = vld [vmem:[#allocation23_spill] sm:$0xff] }
 0x13d   : > { %v3492_v60 = vadd.f32 %v3203_v37, %v4357_v28  ;;  %v1171_v31 = vmul.f32 0.25, %v1011_v11  ;;  %v1329_v47 = vrot.slane %v4358_v19, 7  ;;  %v1636_v9 = vadd.f32 %v1604_v40, %v3474_v51  ;;  %v1880_v37 = vpop.permute.xlu2 %1879 }
 0x13e   : > { %v1626_v45 = vadd.f32 %v1594_v23, %v3477_v21  ;;  %v1783_v10 = vsel %vm1781_vm4, %v1174_v17, %v1688_v24  ;;  %v1204_v50 = vadd.f32 %v1172_v57, %v4359_v62  ;;  %v4360_v27 = vrot.slane %v3448_v4, 1  ;;  %v4362_v23 = vld [vmem:[#allocation20_spill] sm:$0xff] }
 0x13f   : > { %1816 = vst.msk [vmem:[%s3159_s25 + $0x8] sm:$0xff] %vm1814_vm5, %v1783_v10  ;;  %v1420_v19 = vsel %vm1012_vm3, %v1418_v16, %v1419_v42  ;;  %v1143_v40 = vmul.f32 0.25, %v997_v0  ;;  %v920_v13 = vrot.slane %v4361_v29, 7  ;;  %1909 = vrot.lane.b32.xlu2 %v1636_v9, %s2303_s18  ;;  %v1975_v5 = vsel %vm1781_vm4, %v3167_v39, %v1880_v37  ;;  %v4365_v16 = vld [vmem:[#allocation26_spill] sm:$0xff]  ;;  %v4369_v29 = vld [vmem:[#allocation31_spill] sm:$0xff] }
 0x140   : > { %v1054_v11 = vsel %vm1012_vm3, %v1052_v53, %v4360_v27  ;;  %1889 = vrot.lane.b32.xlu1 %v1626_v45, %s2303_s18  ;;  %v1194_v57 = vadd.f32 %v1162_v52, %v4362_v23  ;;  %v4363_v24 = vrot.slane %v3251_v15, 1  ;;  %2209 = vst.msk [vmem:[%s3159_s25 + $0x10] sm:$0xff] %vm1814_vm5, %v1975_v5  ;;  %v4364_v42 = vrot.slane %v3177_v49, 1  ;;  %v4367_v52 = vld [vmem:[#allocation25_spill] sm:$0xff] }
 0x141   : > { %v3526_v0 = vadd.f32 %v1171_v31, %v4365_v16  ;;  %v4366_v28 = vrot.slane %v2684_v59, 7  ;;  %v4212_v9 = vrot.slane %v4367_v52, 7  ;;  %v3533_v45 = vmul.f32 0.75, %v3444_v18  ;;  %v4375_v18 = vld [vmem:[#allocation29_spill] sm:$0xff] }
 0x142   : > { %v1485_v17 = vsel %vm1012_vm3, %v4363_v24, %v3251_v15  ;;  %v1480_v53 = vsel %vm1012_vm3, %v4364_v42, %v3177_v49  ;;  %v1231_v10 = vmul.f32 0.25, %v1054_v11  ;;  %v3536_v62 = vmul.f32 0.75, %v3054_v14  ;;  %v4371_v11 = vld [vmem:[#allocation34_spill] sm:$0xff] }
 0x143   : > { %v1330_v39 = vsel %vm915_vm2, %v4366_v28, %v1329_v47  ;;  %4368 = vst [vmem:[#allocation3_spill] sm:$0xff] %v3533_v45  ;;  %v1603_v37 = vmul.f32 0.25, %v1420_v19  ;;  %v3539_v27 = vmul.f32 0.75, %v3251_v15  ;;  %v1606_v31 = vmul.f32 0.25, %v1485_v17  ;;  %v1748_v47 = vpop.permute.xlu1 %1747 }
 0x144   : > { %v3542_v5 = vadd.f32 %v1143_v40, %v4369_v29  ;;  %v921_v59 = vsel %vm915_vm2, %v919_v36, %v920_v13  ;;  %v3546_v23 = vmul.f32 0.75, %v3177_v49  ;;  %v1596_v24 = vmul.f32 0.25, %v1480_v53  ;;  %1887 = vrot.lane.b32.xlu0 %v3361_v7, %s2303_s18  ;;  %v4373_v29 = vld [vmem:[#allocation30_spill] sm:$0xff] }
 0x145   : > { %v935_v42 = vrot.slane %v4371_v11, 7  ;;  %v4214_v16 = vrot.slane %v3040_v25, 7  ;;  %v1813_v19 = vsel %vm1781_vm4, %v1204_v50, %v1748_v47  ;;  %v4372_v28 = vrot.slane %v3259_v38, 1  ;;  %v1728_v50 = vpop.permute.xlu0 %1727 }
 0x146   : > { %4370 = vst [vmem:[#allocation14_spill] sm:$0xff] %v3546_v23  ;;  %v1544_v40 = vmul.f32 0.25, %v1330_v39  ;;  %v1395_v36 = vsel %vm915_vm2, %v4367_v52, %v4212_v9  ;;  %v1263_v13 = vadd.f32 %v1231_v10, %v3533_v45  ;;  %v1635_v53 = vadd.f32 %v1603_v37, %v3536_v62 }
 0x147   : > { %v1107_v17 = vsel %vm1012_vm3, %v4372_v28, %v3259_v38  ;;  %1846 = vst.msk [vmem:[%s3159_s25 + $0x1e8] sm:$0xff] %vm1814_vm5, %v1813_v19  ;;  %v934_v47 = vrot.slane %v4373_v29, 7  ;;  %v1384_v39 = vsel %vm915_vm2, %v3040_v25, %v4214_v16  ;;  %v1803_v11 = vsel %vm1781_vm4, %v1194_v57, %v1728_v50  ;;  %v4374_v57 = vld [vmem:[#allocation32_spill] sm:$0xff] }
 0x148   : > { %v1138_v28 = vmul.f32 0.75, %v3259_v38  ;;  %v1638_v10 = vadd.f32 %v1606_v31, %v3539_v27  ;;  %v1531_v37 = vmul.f32 0.25, %v1384_v39  ;;  %1737 = vrot.lane.b32.xlu2 %v1263_v13, %s2303_s18  ;;  %1907 = vrot.lane.b32.xlu1 %v1635_v53, %s2303_s18  ;;  %1836 = vst.msk [vmem:[%s3159_s25 + $0x148] sm:$0xff] %vm1814_vm5, %v1803_v11  ;;  %v1234_v7 = vmul.f32 0.25, %v1107_v17  ;;  %v1732_v39 = vpop.permute.xlu2 %1731 }
 0x149   : > { %v1144_v19 = vmul.f32 0.25, %v921_v59  ;;  %v1553_v9 = vmul.f32 0.25, %v1395_v36  ;;  %v936_v45 = vsel %vm915_vm2, %v934_v47, %v935_v42  ;;  %v1628_v16 = vadd.f32 %v1596_v24, %v3546_v23  ;;  %v4378_v59 = vld [vmem:[#allocation40_spill] sm:$0xff] }
 0x14a   : > { %v3580_v50 = vadd.f32 %v1544_v40, %v4374_v57  ;;  %v4376_v31 = vrot.slane %v4375_v18, 1  ;;  %v944_v53 = vrot.slane %v3194_v32, 7  ;;  %v1433_v17 = vrot.slane %v3488_v34, 1 }
 0x14b   : > { %v3590_v36 = vadd.f32 %v1531_v37, %v3405_v33  ;;  %v959_v24 = vrot.slane %v3259_v38, 7  ;;  %v1805_v42 = vsel %vm1781_vm4, %v3226_v2, %v1732_v39  ;;  %v1154_v40 = vmul.f32 0.25, %v936_v45 }
 0x14c   : > { %v1491_v13 = vsel %vm1012_vm3, %v4376_v31, %v4375_v18  ;;  %v4219_v11 = vrot.slane %v3106_v46, 7  ;;  %v943_v57 = vrot.slane %v3049_v26, 7  ;;  %1838 = vst.msk [vmem:[%s3159_s25 + $0x168] sm:$0xff] %vm1814_vm5, %v1805_v42  ;;  %v1266_v32 = vadd.f32 %v1234_v7, %v1138_v28  ;;  %v4377_v31 = vld [vmem:[#allocation35_spill] sm:$0xff]  ;;  %1893 = vrot.lane.b32.xlu0 %v1628_v16, %s2303_s18 }
 0x14d   : > { %v3600_v23 = vadd.f32 %v1144_v19, %v4377_v31  ;;  %v3603_v58 = vadd.f32 %v1553_v9, %v4378_v59  ;;  %v3606_v33 = vmul.f32 0.75, %v4375_v18  ;;  %v1520_v38 = vmul.f32 0.75, %v3276_v48  ;;  %v1746_v7 = vpop.permute.xlu0 %1745 }
 0x14e   : > { %v1618_v2 = vmul.f32 0.25, %v1491_v13  ;;  %v960_v45 = vsel %vm915_vm2, %v4219_v11, %v959_v24  ;;  %v945_v37 = vsel %vm915_vm2, %v943_v57, %v944_v53  ;;  %v4379_v19 = vrot.slane %v3492_v60, 1  ;;  %v4381_v53 = vld [vmem:[#allocation42_spill] sm:$0xff] }
 0x14f   : > { %v4380_v39 = vrot.slane %v3276_v48, 1  ;;  %v1170_v42 = vmul.f32 0.25, %v960_v45  ;;  %v1160_v13 = vmul.f32 0.25, %v945_v37  ;;  %v1812_v31 = vsel %vm1781_vm4, %v3526_v0, %v1746_v7 }
 0x150   : > { %v1435_v9 = vsel %vm1012_vm3, %v1433_v17, %v4379_v19  ;;  %v3624_v24 = vmul.f32 0.75, %v3488_v34  ;;  %v3627_v16 = vadd.f32 %v1154_v40, %v4381_v53  ;;  %v1002_v11 = vsel %vm915_vm2, %v4373_v29, %v934_v47  ;;  %1743 = vrot.lane.b32.xlu2 %v1266_v32, %s2303_s18  ;;  %1913 = vrot.lane.b32.xlu1 %v1638_v10, %s2303_s18  ;;  %v1922_v47 = vpop.permute.xlu2 %1921  ;;  %v1690_v10 = vpop.permute.xlu1 %1689 }
 0x151   : > { %v1490_v59 = vsel %vm1012_vm3, %v4380_v39, %v3276_v48  ;;  %1845 = vst.msk [vmem:[%s3159_s25 + $0x1e0] sm:$0xff] %vm1814_vm5, %v1812_v31  ;;  %v3635_v17 = vadd.f32 %v1170_v42, %v1138_v28  ;;  %v3638_v45 = vadd.f32 %v1160_v13, %v3408_v61  ;;  %v1005_v0 = vsel %vm915_vm2, %v3049_v26, %v943_v57  ;;  %v4383_v42 = vld [vmem:[#allocation38_spill] sm:$0xff] }
 0x152   : > { %v1613_v40 = vmul.f32 0.25, %v1435_v9  ;;  %v1616_v37 = vmul.f32 0.25, %v1490_v59  ;;  %v1322_v7 = vrot.slane %v3054_v14, 7  ;;  %v1323_v29 = vrot.slane %v3236_v22, 7  ;;  %v4384_v13 = vld [vmem:[#allocation50_spill] sm:$0xff] }
 0x153   : > { %v4382_v28 = vrot.slane %v3448_v4, 1  ;;  %v3649_v61 = vadd.f32 %v1618_v2, %v3606_v33  ;;  %v1159_v19 = vmul.f32 0.25, %v1005_v0  ;;  %v1341_v26 = vrot.slane %v3276_v48, 7 }
 0x154   : > { %v1996_v57 = vsel %vm1781_vm4, %v3247_v43, %v1922_v47  ;;  %v1784_v22 = vsel %vm1781_vm4, %v3542_v5, %v1690_v10  ;;  %v1324_v9 = vsel %vm915_vm2, %v1322_v7, %v1323_v29  ;;  %v1340_v39 = vrot.slane %v3122_v6, 7  ;;  %1911 = vrot.lane.b32.xlu0 %v3352_v1, %s2303_s18 }
 0x155   : > { %v1106_v32 = vsel %vm1012_vm3, %v4382_v28, %v3448_v4  ;;  %2230 = vst.msk [vmem:[%s3159_s25 + $0x158] sm:$0xff] %vm1814_vm5, %v1996_v57  ;;  %v1316_v59 = vrot.slane %v2770_v41, 7  ;;  %v1317_v2 = vrot.slane %v4383_v42, 7  ;;  %v937_v31 = vrot.slane %v4384_v13, 7  ;;  %v1918_v29 = vpop.permute.xlu0 %1917 }
 0x156   : > { %v1540_v53 = vmul.f32 0.25, %v1324_v9  ;;  %1817 = vst.msk [vmem:[%s3159_s25 + $0x20] sm:$0xff] %vm1814_vm5, %v1784_v22  ;;  %v1645_v43 = vadd.f32 %v1613_v40, %v3624_v24  ;;  %v3667_v48 = vadd.f32 %v1159_v19, %v3272_v20  ;;  %v1342_v5 = vsel %vm915_vm2, %v1340_v39, %v1341_v26 }
 0x157   : > { %v1388_v0 = vsel %vm915_vm2, %v3054_v14, %v1322_v7  ;;  %v3677_v47 = vmul.f32 0.75, %v3448_v4  ;;  %v1232_v10 = vmul.f32 0.25, %v1106_v32  ;;  %v1552_v20 = vmul.f32 0.25, %v1342_v5 }
 0x158   : > { %v3680_v40 = vadd.f32 %v1540_v53, %v3474_v51  ;;  %v1994_v28 = vsel %vm1781_vm4, %v3580_v50, %v1918_v29  ;;  %v1648_v19 = vadd.f32 %v1616_v37, %v1520_v38  ;;  %v1539_v26 = vmul.f32 0.25, %v1388_v0  ;;  %1927 = vrot.lane.b32.xlu2 %v1645_v43, %s2303_s18  ;;  %1741 = vrot.lane.b32.xlu1 %v3398_v55, %s2303_s18  ;;  %v1692_v22 = vpop.permute.xlu1 %1691 }
 0x159   : > { %v1346_v57 = vrot.slane %v4334_v3, 7  ;;  %2228 = vst.msk [vmem:[%s3159_s25 + $0x138] sm:$0xff] %vm1814_vm5, %v1994_v28  ;;  %v3690_v14 = vmul.f32 0.25, %v1002_v11  ;;  %v3695_v1 = vsel %vm915_vm2, %v1316_v59, %v1317_v2  ;;  %v3697_v51 = vadd.f32 %v1552_v20, %v1520_v38  ;;  %v1694_v38 = vpop.permute.xlu2 %1693 }
 0x15a   : > { %v1325_v50 = vrot.slane %v3060_v30, 7  ;;  %v4385_v37 = vrot.slane %v4335_v56, 1  ;;  %v3707_v55 = vmul.f32 0.75, %v4335_v56  ;;  %v1307_v11 = vrot.slane %v3037_v54, 7 }
 0x15b   : > { %v1308_v32 = vrot.slane %v3171_v63, 7  ;;  %v1264_v9 = vadd.f32 %v1232_v10, %v3677_v47  ;;  %v1003_v42 = vsel %vm915_vm2, %v4384_v13, %v937_v31  ;;  %v3717_v2 = vadd.f32 %v1539_v26, %v3536_v62 }
 0x15c   : > { %v3704_v7 = vsel %vm1012_vm3, %v4385_v37, %v4335_v56  ;;  %v1396_v53 = vsel %vm915_vm2, %v4334_v3, %v1346_v57  ;;  %v1785_v63 = vsel %vm1781_vm4, %v3600_v23, %v1692_v22  ;;  %v1786_v43 = vsel %vm1781_vm4, %v3347_v12, %v1694_v38  ;;  %v4398_v3 = vld [vmem:[#allocation37_spill] sm:$0xff] }
 0x15d   : > { %v4386_v5 = vrot.slane %v3492_v60, 1  ;;  %v3732_v29 = vmul.f32 0.75, %v3492_v60  ;;  %1818 = vst.msk [vmem:[%s3159_s25 + $0x28] sm:$0xff] %vm1814_vm5, %v1785_v63  ;;  %v1309_v62 = vsel %vm915_vm2, %v1307_v11, %v1308_v32  ;;  %v1383_v10 = vsel %vm915_vm2, %v3037_v54, %v1307_v11  ;;  %1739 = vrot.lane.b32.xlu0 %v1264_v9, %s2303_s18 }
 0x15e   : > { %v1389_v23 = vsel %vm915_vm2, %v3060_v30, %v1325_v50  ;;  %v1344_v12 = vrot.slane %v4375_v18, 7  ;;  %1819 = vst.msk [vmem:[%s3159_s25 + $0x40] sm:$0xff] %vm1814_vm5, %v1786_v43  ;;  %v1530_v20 = vmul.f32 0.25, %v1309_v62  ;;  %v1529_v28 = vmul.f32 0.25, %v1383_v10  ;;  %v4391_v10 = vld [vmem:[#allocation5_spill] sm:$0xff] }
 0x15f   : > { %v1489_v0 = vsel %vm1012_vm3, %v4386_v5, %v3492_v60  ;;  %v1555_v26 = vmul.f32 0.25, %v1396_v53  ;;  %v1326_v37 = vrot.slane %v3251_v15, 7  ;;  %v1311_v32 = vrot.slane %v3177_v49, 7  ;;  %v1936_v49 = vpop.permute.xlu0 %1935 }
 0x160   : > { %v1614_v22 = vmul.f32 0.25, %v1489_v0  ;;  %v4387_v38 = vrot.slane %v3106_v46, 7  ;;  %v1347_v30 = vrot.slane %v4335_v56, 7  ;;  %v3753_v18 = vadd.f32 %v1530_v20, %v3477_v21  ;;  %1933 = vrot.lane.b32.xlu2 %v1648_v19, %s2303_s18  ;;  %1931 = vrot.lane.b32.xlu1 %v3462_v8, %s2303_s18  ;;  %v1712_v8 = vpop.permute.xlu1 %1711  ;;  %v4390_v0 = vld [vmem:[#allocation15_spill] sm:$0xff] }
 0x161   : > { %v3756_v11 = vadd.f32 %v1529_v28, %v3333_v35  ;;  %v3759_v15 = vadd.f32 %v1555_v26, %v3402_v44  ;;  %v1327_v9 = vsel %vm915_vm2, %v1325_v50, %v1326_v37  ;;  %v4388_v56 = vrot.slane %v3040_v25, 7  ;;  %v1696_v25 = vpop.permute.xlu2 %1695  ;;  %v4393_v28 = vld [vmem:[#allocation28_spill] sm:$0xff] }
 0x162   : > { %v1010_v54 = vsel %vm915_vm2, %v3106_v46, %v4387_v38  ;;  %v1542_v46 = vmul.f32 0.25, %v1327_v9  ;;  %v1541_v63 = vmul.f32 0.25, %v1389_v23  ;;  %v2003_v35 = vsel %vm1781_vm4, %v3603_v58, %v1936_v49  ;;  %v4394_v38 = vld [vmem:[#allocation14_spill] sm:$0xff] }
 0x163   : > { %v1312_v21 = vsel %vm915_vm2, %v4388_v56, %v1311_v32  ;;  %v1169_v53 = vmul.f32 0.25, %v1010_v54  ;;  %v1337_v44 = vrot.slane %v3488_v34, 7  ;;  %v4389_v19 = vrot.slane %v4367_v52, 7  ;;  %2237 = vst.msk [vmem:[%s3159_s25 + $0x1d0] sm:$0xff] %vm1814_vm5, %v2003_v35  ;;  %v4397_v35 = vld [vmem:[#allocation47_spill] sm:$0xff] }
 0x164   : > { %v1532_v50 = vmul.f32 0.25, %v1312_v21  ;;  %v3777_v5 = vadd.f32 %v1542_v46, %v3539_v27  ;;  %v3783_v58 = vadd.f32 %v1541_v63, %v4391_v10  ;;  %v1394_v52 = vsel %vm915_vm2, %v3122_v6, %v1340_v39  ;;  %v4395_v46 = vld [vmem:[#allocation55_spill] sm:$0xff]  ;;  %v4403_v10 = vld [vmem:[#allocation68_spill] sm:$0xff] }
 0x165   : > { %v1345_v43 = vsel %vm915_vm2, %v4389_v19, %v1344_v12  ;;  %v3780_v62 = vadd.f32 %v1169_v53, %v4390_v0  ;;  %v1795_v23 = vsel %vm1781_vm4, %v3627_v16, %v1712_v8  ;;  %v4392_v12 = vld [vmem:[#allocation4_spill] sm:$0xff]  ;;  %v1302_v27 = vrot.slane %v4393_v28, 7  ;;  %v4396_v21 = vld [vmem:[#allocation43_spill] sm:$0xff] }
 0x166   : > { %v1787_v20 = vsel %vm1781_vm4, %v4392_v12, %v1696_v25  ;;  %v1393_v26 = vsel %vm915_vm2, %v3488_v34, %v1337_v44  ;;  %1828 = vst.msk [vmem:[%s3159_s25 + $0xc8] sm:$0xff] %vm1814_vm5, %v1795_v23  ;;  %v1646_v37 = vadd.f32 %v1614_v22, %v3732_v29  ;;  %v3802_v6 = vadd.f32 %v1532_v50, %v4394_v38  ;;  %v4402_v25 = vld [vmem:[#allocation48_spill] sm:$0xff]  ;;  %v4404_v23 = vld [vmem:[#allocation33_spill] sm:$0xff] }
 0x167   : > { %v1549_v32 = vmul.f32 0.25, %v1393_v26  ;;  %v1551_v39 = vmul.f32 0.25, %v1394_v52  ;;  %1820 = vst.msk [vmem:[%s3159_s25 + $0x48] sm:$0xff] %vm1814_vm5, %v1787_v20  ;;  %v1536_v16 = vmul.f32 0.25, %v3695_v1  ;;  %v1155_v54 = vmul.f32 0.25, %v1003_v42 }
 0x168   : > { %v1554_v9 = vmul.f32 0.25, %v1345_v43  ;;  %v1348_v49 = vsel %vm915_vm2, %v1346_v57, %v1347_v30  ;;  %1929 = vrot.lane.b32.xlu0 %v1646_v37, %s2303_s18  ;;  %v1305_v56 = vrot.slane %v4395_v46, 7  ;;  %v1185_v1 = vadd.f32 %v3690_v14, %v4397_v35  ;;  %1939 = vrot.lane.b32.xlu2 %v4398_v3, %s2303_s18  ;;  %v1710_v57 = vpop.permute.xlu0 %1709  ;;  %v4399_v30 = vld [vmem:[#allocation27_spill] sm:$0xff]  ;;  %v4401_v43 = vld [vmem:[#allocation44_spill] sm:$0xff]  ;;  %v1902_v52 = vpop.permute.xlu1 %1901 }
 0x169   : > { %v3813_v22 = vadd.f32 %v1549_v32, %v3624_v24  ;;  %v3816_v53 = vadd.f32 %v1551_v39, %v4396_v21  ;;  %v1556_v63 = vmul.f32 0.25, %v1348_v49  ;;  %1937 = vrot.lane.b32.xlu1 %v3649_v61, %s2303_s18  ;;  %v1620_v24 = vmul.f32 0.25, %v3704_v7  ;;  %v1714_v7 = vpop.permute.xlu2 %1713  ;;  %v4408_v21 = vld [vmem:[#allocation61_spill] sm:$0xff]  ;;  %v4409_v35 = vld [vmem:[#allocation39_spill] sm:$0xff] }
 0x16a   : > { %v3821_v42 = vadd.f32 %v1554_v9, %v3606_v33  ;;  %v4400_v50 = vrot.slane %v4399_v30, 7  ;;  %v1304_v14 = vrot.slane %v4401_v43, 7  ;;  %v1794_v8 = vsel %vm1781_vm4, %v1185_v1, %v1710_v57  ;;  %v4407_v9 = vld [vmem:[#allocation60_spill] sm:$0xff] }
 0x16b   : > { %v3833_v33 = vadd.f32 %v1556_v63, %v3707_v55  ;;  %v1568_v0 = vadd.f32 %v1536_v16, %v4402_v25  ;;  %v1187_v61 = vadd.f32 %v1155_v54, %v4403_v10  ;;  %1827 = vst.msk [vmem:[%s3159_s25 + $0xc0] sm:$0xff] %vm1814_vm5, %v1794_v8  ;;  %v4405_v12 = vrot.slane %v4404_v23, 7  ;;  %v4406_v16 = vld [vmem:[#allocation52_spill] sm:$0xff] }
 0x16c   : > { %v1303_v19 = vsel %vm915_vm2, %v4400_v50, %v1302_v27  ;;  %v1306_v28 = vsel %vm915_vm2, %v1304_v14, %v1305_v56  ;;  %v1652_v32 = vadd.f32 %v1620_v24, %v3707_v55  ;;  %v1319_v54 = vrot.slane %v4406_v16, 7  ;;  %v4410_v24 = vld [vmem:[#allocation36_spill] sm:$0xff] }
 0x16d   : > { %v1007_v20 = vsel %vm915_vm2, %v4404_v23, %v4405_v12  ;;  %v1986_v27 = vsel %vm1781_vm4, %v1568_v0, %v1902_v52  ;;  %v1796_v26 = vsel %vm1781_vm4, %v1187_v61, %v1714_v7  ;;  %v1526_v37 = vmul.f32 0.25, %v1303_v19  ;;  %v4412_v25 = vld [vmem:[#allocation56_spill] sm:$0xff]  ;;  %v4413_v52 = vld [vmem:[#allocation63_spill] sm:$0xff]  ;;  %v4414_v23 = vld [vmem:[#allocation65_spill] sm:$0xff] }
 0x16e   : > { %2220 = vst.msk [vmem:[%s3159_s25 + $0xb8] sm:$0xff] %vm1814_vm5, %v1986_v27  ;;  %v1163_v38 = vmul.f32 0.25, %v1007_v20  ;;  %v1528_v39 = vmul.f32 0.25, %v1306_v28  ;;  %v1386_v56 = vsel %vm915_vm2, %v2770_v41, %v1316_v59  ;;  %v4411_v30 = vrot.slane %v4410_v24, 7 }
 0x16f   : > { %1829 = vst.msk [vmem:[%s3159_s25 + $0xe0] sm:$0xff] %vm1814_vm5, %v1796_v26  ;;  %v1558_v49 = vadd.f32 %v1526_v37, %v4407_v9  ;;  %v1387_v19 = vsel %vm915_vm2, %v4406_v16, %v1319_v54  ;;  %v1535_v8 = vmul.f32 0.25, %v1386_v56  ;;  %v938_v0 = vrot.slane %v4412_v25, 7  ;;  %v4415_v26 = vld [vmem:[#allocation66_spill] sm:$0xff]  ;;  %v4417_v56 = vld [vmem:[#allocation57_spill] sm:$0xff] }
 0x170   : > { %1941 = vrot.lane.b32.xlu0 %v1652_v32, %s2303_s18  ;;  %v1882_v46 = vpop.permute.xlu0 %1881  ;;  %v1195_v63 = vadd.f32 %v1163_v38, %v4408_v21  ;;  %v1560_v1 = vadd.f32 %v1528_v39, %v4409_v35  ;;  %v1730_v3 = vpop.permute.xlu1 %1729  ;;  %v1391_v50 = vsel %vm915_vm2, %v4410_v24, %v4411_v30  ;;  %v1537_v61 = vmul.f32 0.25, %v1387_v19  ;;  %v4416_v32 = vld [vmem:[#allocation8_spill] sm:$0xff]  ;;  %v4419_v35 = vld [vmem:[#allocation58_spill] sm:$0xff]  ;;  %v4423_v25 = vld [vmem:[#allocation69_spill] sm:$0xff] }
 0x171   : > { %v1976_v55 = vsel %vm1781_vm4, %v1558_v49, %v1882_v46  ;;  %v1886_v57 = vpop.permute.xlu2 %1885  ;;  %v1545_v10 = vmul.f32 0.25, %v1391_v50  ;;  %v928_v7 = vrot.slane %v4413_v52, 7  ;;  %v1567_v12 = vadd.f32 %v1535_v8, %v4414_v23  ;;  %v4421_v24 = vld [vmem:[#allocation6_spill] sm:$0xff]  ;;  %v4422_v50 = vld [vmem:[#allocation67_spill] sm:$0xff] }
 0x172   : > { %2210 = vst.msk [vmem:[%s3159_s25 + $0x18] sm:$0xff] %vm1814_vm5, %v1976_v55  ;;  %v1804_v41 = vsel %vm1781_vm4, %v1195_v63, %v1730_v3  ;;  %v1978_v59 = vsel %vm1781_vm4, %v1560_v1, %v1886_v57  ;;  %v939_v28 = vsel %vm915_vm2, %v937_v31, %v938_v0  ;;  %v1569_v38 = vadd.f32 %v1537_v61, %v4416_v32  ;;  %v4420_v3 = vld [vmem:[#allocation64_spill] sm:$0xff] }
 0x173   : > { %1837 = vst.msk [vmem:[%s3159_s25 + $0x160] sm:$0xff] %vm1814_vm5, %v1804_v41  ;;  %v1577_v37 = vadd.f32 %v1545_v10, %v4415_v26  ;;  %v1382_v9 = vsel %vm915_vm2, %v4401_v43, %v1304_v14  ;;  %v1000_v13 = vsel %vm915_vm2, %v4413_v52, %v928_v7  ;;  %v1156_v46 = vmul.f32 0.25, %v939_v28  ;;  %v4418_v43 = vld [vmem:[#allocation53_spill] sm:$0xff] }
 0x174   : > { %2212 = vst.msk [vmem:[%s3159_s25 + $0x38] sm:$0xff] %vm1814_vm5, %v1978_v59  ;;  %v1320_v55 = vrot.slane %v4417_v56, 7  ;;  %v1527_v21 = vmul.f32 0.25, %v1382_v9  ;;  %v1149_v63 = vmul.f32 0.25, %v1000_v13  ;;  %v952_v14 = vrot.slane %v4418_v43, 7  ;;  %v4424_v10 = vld [vmem:[#allocation41_spill] sm:$0xff] }
 0x175   : > { %v953_v1 = vrot.slane %v4419_v35, 7  ;;  %v940_v57 = vrot.slane %v4420_v3, 7  ;;  %v941_v30 = vrot.slane %v4421_v24, 7  ;;  %v1188_v19 = vadd.f32 %v1156_v46, %v4422_v50  ;;  %v4427_v13 = vld [vmem:[#allocation72_spill] sm:$0xff] }
 0x176   : > { %v1321_v59 = vsel %vm915_vm2, %v1319_v54, %v1320_v55  ;;  %v1559_v0 = vadd.f32 %v1527_v21, %v4423_v25  ;;  %v1181_v61 = vadd.f32 %v1149_v63, %v4424_v10  ;;  %v1008_v46 = vsel %vm915_vm2, %v4418_v43, %v952_v14  ;;  %v4428_v55 = vld [vmem:[#allocation73_spill] sm:$0xff] }
 0x177   : > { %v942_v28 = vsel %vm915_vm2, %v940_v57, %v941_v30  ;;  %v1538_v26 = vmul.f32 0.25, %v1321_v59  ;;  %v4429_v63 = vld [vmem:[#allocation21_spill] sm:$0xff] }
 0x178   : > { %v1900_v20 = vpop.permute.xlu0 %1899  ;;  %v1920_v39 = vpop.permute.xlu1 %1919  ;;  %v1158_v32 = vmul.f32 0.25, %v942_v28 }
 0x179   : > { %v1985_v27 = vsel %vm1781_vm4, %v1567_v12, %v1900_v20  ;;  %v1904_v16 = vpop.permute.xlu2 %1903  ;;  %v1995_v31 = vsel %vm1781_vm4, %v1577_v37, %v1920_v39  ;;  %v954_v20 = vsel %vm915_vm2, %v952_v14, %v953_v1  ;;  %v4430_v14 = vld [vmem:[#allocation62_spill] sm:$0xff] }
 0x17a   : > { %2219 = vst.msk [vmem:[%s3159_s25 + $0xb0] sm:$0xff] %vm1814_vm5, %v1985_v27  ;;  %v1987_v49 = vsel %vm1781_vm4, %v1569_v38, %v1904_v16  ;;  %v1166_v37 = vmul.f32 0.25, %v954_v20  ;;  %v4425_v38 = vld [vmem:[#allocation54_spill] sm:$0xff]  ;;  %v4426_v16 = vld [vmem:[#allocation59_spill] sm:$0xff]  ;;  %v1190_v35 = vadd.f32 %v1158_v32, %v4429_v63  ;;  %v925_v59 = vrot.slane %v4430_v14, 7  ;;  %v4433_v20 = vld [vmem:[#allocation17_spill] sm:$0xff] }
 0x17b   : > { %2229 = vst.msk [vmem:[%s3159_s25 + $0x150] sm:$0xff] %vm1814_vm5, %v1995_v31  ;;  %v1334_v39 = vrot.slane %v4425_v38, 7  ;;  %v1335_v9 = vrot.slane %v4426_v16, 7  ;;  %v1570_v31 = vadd.f32 %v1538_v26, %v4427_v13  ;;  %v4435_v13 = vld [vmem:[#allocation7_spill] sm:$0xff] }
 0x17c   : > { %2221 = vst.msk [vmem:[%s3159_s25 + $0xd0] sm:$0xff] %vm1814_vm5, %v1987_v49  ;;  %v1198_v21 = vadd.f32 %v1166_v37, %v4428_v55  ;;  %v4436_v55 = vld [vmem:[#allocation10_spill] sm:$0xff] }
 0x17d   : > { %v1336_v30 = vsel %vm915_vm2, %v1334_v39, %v1335_v9 }
 0x17e   : > { %v1548_v43 = vmul.f32 0.25, %v1336_v30 }
 0x180   : > { %v1716_v41 = vpop.permute.xlu0 %1715  ;;  %v1884_v23 = vpop.permute.xlu1 %1883  ;;  %v1580_v28 = vadd.f32 %v1548_v43, %v4433_v20 }
 0x181   : > { %v1797_v8 = vsel %vm1781_vm4, %v1188_v19, %v1716_v41  ;;  %v1702_v12 = vpop.permute.xlu2 %1701  ;;  %v1977_v27 = vsel %vm1781_vm4, %v1559_v0, %v1884_v23  ;;  %v1165_v41 = vmul.f32 0.25, %v1008_v46  ;;  %v4432_v0 = vld [vmem:[#allocation2_spill] sm:$0xff]  ;;  %v1392_v23 = vsel %vm915_vm2, %v4425_v38, %v1334_v39  ;;  %v4434_v39 = vld [vmem:[#allocation9_spill] sm:$0xff] }
 0x182   : > { %1830 = vst.msk [vmem:[%s3159_s25 + $0xe8] sm:$0xff] %vm1814_vm5, %v1797_v8  ;;  %v1790_v54 = vsel %vm1781_vm4, %v1181_v61, %v1702_v12  ;;  %v4431_v8 = vld [vmem:[#allocation70_spill] sm:$0xff]  ;;  %v1547_v16 = vmul.f32 0.25, %v1392_v23  ;;  %v955_v9 = vrot.slane %v4434_v39, 7  ;;  %v999_v46 = vsel %vm915_vm2, %v4430_v14, %v925_v59 }
 0x183   : > { %2211 = vst.msk [vmem:[%s3159_s25 + $0x30] sm:$0xff] %vm1814_vm5, %v1977_v27  ;;  %v926_v25 = vrot.slane %v4431_v8, 7  ;;  %v1197_v10 = vadd.f32 %v1165_v41, %v4432_v0  ;;  %v4440_v0 = vld [vmem:[#allocation11_spill] sm:$0xff] }
 0x184   : > { %1823 = vst.msk [vmem:[%s3159_s25 + $0x80] sm:$0xff] %vm1814_vm5, %v1790_v54 }
 0x185   : > { %v927_v26 = vsel %vm915_vm2, %v925_v59, %v926_v25  ;;  %v4438_v59 = vld [vmem:[#allocation12_spill] sm:$0xff] }
 0x186   : > { %v1148_v38 = vmul.f32 0.25, %v927_v26 }
 0x188   : > { %v1906_v49 = vpop.permute.xlu0 %1905  ;;  %v1736_v1 = vpop.permute.xlu1 %1735 }
 0x189   : > { %v1988_v56 = vsel %vm1781_vm4, %v1570_v31, %v1906_v49  ;;  %v1720_v24 = vpop.permute.xlu2 %1719  ;;  %v1807_v50 = vsel %vm1781_vm4, %v1198_v21, %v1736_v1  ;;  %v1579_v31 = vadd.f32 %v1547_v16, %v4435_v13  ;;  %v1004_v1 = vsel %vm915_vm2, %v4420_v3, %v940_v57  ;;  %v4439_v57 = vld [vmem:[#allocation3_spill] sm:$0xff] }
 0x18a   : > { %2222 = vst.msk [vmem:[%s3159_s25 + $0xd8] sm:$0xff] %vm1814_vm5, %v1988_v56  ;;  %v1799_v19 = vsel %vm1781_vm4, %v1190_v35, %v1720_v24  ;;  %v1009_v35 = vsel %vm915_vm2, %v4434_v39, %v955_v9  ;;  %v1157_v14 = vmul.f32 0.25, %v1004_v1  ;;  %v956_v1 = vrot.slane %v3448_v4, 7 }
 0x18b   : > { %1840 = vst.msk [vmem:[%s3159_s25 + $0x188] sm:$0xff] %vm1814_vm5, %v1807_v50  ;;  %v1147_v50 = vmul.f32 0.25, %v999_v46  ;;  %v1167_v43 = vmul.f32 0.25, %v1009_v35  ;;  %v1338_v4 = vrot.slane %v3492_v60, 7 }
 0x18c   : > { %1832 = vst.msk [vmem:[%s3159_s25 + $0x108] sm:$0xff] %vm1814_vm5, %v1799_v19  ;;  %v4437_v19 = vld [vmem:[#allocation71_spill] sm:$0xff] }
 0x18d   : > { %v929_v41 = vrot.slane %v4437_v19, 7  ;;  %v1179_v8 = vadd.f32 %v1147_v50, %v4438_v59  ;;  %v1199_v25 = vadd.f32 %v1167_v43, %v4439_v57 }
 0x190   : > { %v1734_v61 = vpop.permute.xlu0 %1733  ;;  %v1926_v27 = vpop.permute.xlu1 %1925 }
 0x191   : > { %v1806_v12 = vsel %vm1781_vm4, %v1197_v10, %v1734_v61  ;;  %v1892_v54 = vpop.permute.xlu2 %1891  ;;  %v1998_v37 = vsel %vm1781_vm4, %v1580_v28, %v1926_v27  ;;  %v1189_v10 = vadd.f32 %v1157_v14, %v4440_v0 }
 0x192   : > { %1839 = vst.msk [vmem:[%s3159_s25 + $0x180] sm:$0xff] %vm1814_vm5, %v1806_v12  ;;  %v1981_v32 = vsel %vm1781_vm4, %v3590_v36, %v1892_v54  ;;  %v1180_v36 = vadd.f32 %v1148_v38, %v4436_v55 }
 0x193   : > { %2232 = vst.msk [vmem:[%s3159_s25 + $0x178] sm:$0xff] %vm1814_vm5, %v1998_v37 }
 0x194   : > { %2215 = vst.msk [vmem:[%s3159_s25 + $0x70] sm:$0xff] %vm1814_vm5, %v1981_v32 }
 0x198   : > { %v1924_v49 = vpop.permute.xlu0 %1923  ;;  %v1700_v63 = vpop.permute.xlu1 %1699 }
 0x199   : > { %v1997_v56 = vsel %vm1781_vm4, %v1579_v31, %v1924_v49  ;;  %v1910_v21 = vpop.permute.xlu2 %1909  ;;  %v1789_v30 = vsel %vm1781_vm4, %v1180_v36, %v1700_v63 }
 0x19a   : > { %2231 = vst.msk [vmem:[%s3159_s25 + $0x170] sm:$0xff] %vm1814_vm5, %v1997_v56  ;;  %v1990_v24 = vsel %vm1781_vm4, %v3680_v40, %v1910_v21  ;;  %v930_v40 = vsel %vm915_vm2, %v928_v7, %v929_v41  ;;  %v4441_v7 = vld [vmem:[#allocation22_spill] sm:$0xff] }
 0x19b   : > { %2224 = vst.msk [vmem:[%s3159_s25 + $0xf8] sm:$0xff] %vm1814_vm5, %v1990_v24  ;;  %v1150_v52 = vmul.f32 0.25, %v930_v40 }
 0x19c   : > { %1822 = vst.msk [vmem:[%s3159_s25 + $0x68] sm:$0xff] %vm1814_vm5, %v1789_v30 }
 0x19d   : > { %v1182_v27 = vadd.f32 %v1150_v52, %v4441_v7 }
 0x1a0   : > { %v1698_v3 = vpop.permute.xlu0 %1697  ;;  %v1718_v12 = vpop.permute.xlu1 %1717 }
 0x1a1   : > { %v1788_v61 = vsel %vm1781_vm4, %v1179_v8, %v1698_v3  ;;  %v1798_v28 = vsel %vm1781_vm4, %v1189_v10, %v1718_v12 }
 0x1a2   : > { %v1738_v23 = vpop.permute.xlu2 %1737  ;;  %1821 = vst.msk [vmem:[%s3159_s25 + $0x60] sm:$0xff] %vm1814_vm5, %v1788_v61 }
 0x1a3   : > { %v1808_v20 = vsel %vm1781_vm4, %v1199_v25, %v1738_v23  ;;  %1831 = vst.msk [vmem:[%s3159_s25 + $0x100] sm:$0xff] %vm1814_vm5, %v1798_v28 }
 0x1a4   : > { %1841 = vst.msk [vmem:[%s3159_s25 + $0x1a0] sm:$0xff] %vm1814_vm5, %v1808_v20 }
 0x1a8   : > { %v1704_v54 = vpop.permute.xlu0 %1703 }
 0x1a9   : > { %v1791_v26 = vsel %vm1781_vm4, %v1182_v27, %v1704_v54  ;;  %v1724_v32 = vpop.permute.xlu1 %1723 }
 0x1aa   : > { %v1744_v37 = vpop.permute.xlu2 %1743  ;;  %1824 = vst.msk [vmem:[%s3159_s25 + $0x88] sm:$0xff] %vm1814_vm5, %v1791_v26  ;;  %v1801_v38 = vsel %vm1781_vm4, %v3638_v45, %v1724_v32 }
 0x1ab   : > { %v1811_v16 = vsel %vm1781_vm4, %v3635_v17, %v1744_v37  ;;  %1834 = vst.msk [vmem:[%s3159_s25 + $0x128] sm:$0xff] %vm1814_vm5, %v1801_v38 }
 0x1ac   : > { %1844 = vst.msk [vmem:[%s3159_s25 + $0x1c8] sm:$0xff] %vm1814_vm5, %v1811_v16 }
 0x1b0   : > { %v1722_v13 = vpop.permute.xlu0 %1721 }
 0x1b1   : > { %v1800_v31 = vsel %vm1781_vm4, %v3667_v48, %v1722_v13 }
 0x1b2   : > { %v1928_v49 = vpop.permute.xlu2 %1927  ;;  %v1890_v46 = vpop.permute.xlu1 %1889  ;;  %1833 = vst.msk [vmem:[%s3159_s25 + $0x120] sm:$0xff] %vm1814_vm5, %v1800_v31 }
 0x1b3   : > { %v1999_v17 = vsel %vm1781_vm4, %v3813_v22, %v1928_v49  ;;  %v1980_v45 = vsel %vm1781_vm4, %v3753_v18, %v1890_v46 }
 0x1b4   : > { %2233 = vst.msk [vmem:[%s3159_s25 + $0x190] sm:$0xff] %vm1814_vm5, %v1999_v17 }
 0x1b5   : > { %2214 = vst.msk [vmem:[%s3159_s25 + $0x58] sm:$0xff] %vm1814_vm5, %v1980_v45 }
 0x1b8   : > { %v1888_v56 = vpop.permute.xlu0 %1887 }
 0x1b9   : > { %v1979_v48 = vsel %vm1781_vm4, %v3756_v11, %v1888_v56 }
 0x1ba   : > { %v1934_v55 = vpop.permute.xlu2 %1933  ;;  %v1908_v36 = vpop.permute.xlu1 %1907  ;;  %2213 = vst.msk [vmem:[%s3159_s25 + $0x50] sm:$0xff] %vm1814_vm5, %v1979_v48 }
 0x1bb   : > { %v2002_v22 = vsel %vm1781_vm4, %v3697_v51, %v1934_v55  ;;  %v1989_v18 = vsel %vm1781_vm4, %v3717_v2, %v1908_v36 }
 0x1bc   : > { %2236 = vst.msk [vmem:[%s3159_s25 + $0x1b8] sm:$0xff] %vm1814_vm5, %v2002_v22 }
 0x1bd   : > { %2223 = vst.msk [vmem:[%s3159_s25 + $0xf0] sm:$0xff] %vm1814_vm5, %v1989_v18 }
 0x1c0   : > { %v1894_v21 = vpop.permute.xlu0 %1893 }
 0x1c1   : > { %v1982_v11 = vsel %vm1781_vm4, %v3802_v6, %v1894_v21  ;;  %v957_v6 = vsel %vm915_vm2, %v955_v9, %v956_v1 }
 0x1c2   : > { %v1940_v63 = vpop.permute.xlu2 %1939  ;;  %v1914_v35 = vpop.permute.xlu1 %1913  ;;  %2216 = vst.msk [vmem:[%s3159_s25 + $0x78] sm:$0xff] %vm1814_vm5, %v1982_v11  ;;  %v1168_v50 = vmul.f32 0.25, %v957_v6 }
 0x1c3   : > { %v2005_v51 = vsel %vm1781_vm4, %v3759_v15, %v1940_v63  ;;  %v1992_v2 = vsel %vm1781_vm4, %v3777_v5, %v1914_v35 }
 0x1c4   : > { %2239 = vst.msk [vmem:[%s3159_s25 + $0x1f0] sm:$0xff] %vm1814_vm5, %v2005_v51  ;;  %v1200_v39 = vadd.f32 %v1168_v50, %v3677_v47 }
 0x1c5   : > { %2226 = vst.msk [vmem:[%s3159_s25 + $0x118] sm:$0xff] %vm1814_vm5, %v1992_v2 }
 0x1c8   : > { %v1912_v24 = vpop.permute.xlu0 %1911 }
 0x1c9   : > { %v1991_v30 = vsel %vm1781_vm4, %v3783_v58, %v1912_v24  ;;  %v1339_v58 = vsel %vm915_vm2, %v1337_v44, %v1338_v4 }
 0x1ca   : > { %v1742_v15 = vpop.permute.xlu1 %1741  ;;  %2225 = vst.msk [vmem:[%s3159_s25 + $0x110] sm:$0xff] %vm1814_vm5, %v1991_v30  ;;  %v1550_v43 = vmul.f32 0.25, %v1339_v58 }
 0x1cb   : > { %v1810_v5 = vsel %vm1781_vm4, %v3780_v62, %v1742_v15 }
 0x1cc   : > { %1843 = vst.msk [vmem:[%s3159_s25 + $0x1c0] sm:$0xff] %vm1814_vm5, %v1810_v5  ;;  %v1582_v60 = vadd.f32 %v1550_v43, %v3732_v29 }
 0x1d0   : > { %v1740_v9 = vpop.permute.xlu0 %1739 }
 0x1d1   : > { %v1809_v19 = vsel %vm1781_vm4, %v1200_v39, %v1740_v9 }
 0x1d2   : > { %v1932_v41 = vpop.permute.xlu1 %1931  ;;  %1842 = vst.msk [vmem:[%s3159_s25 + $0x1a8] sm:$0xff] %vm1814_vm5, %v1809_v19 }
 0x1d3   : > { %v2001_v62 = vsel %vm1781_vm4, %v3816_v53, %v1932_v41 }
 0x1d4   : > { %2235 = vst.msk [vmem:[%s3159_s25 + $0x1b0] sm:$0xff] %vm1814_vm5, %v2001_v62 }
 0x1da   : > { %v1930_v47 = vpop.permute.xlu0 %1929 }
 0x1db   : > { %v2000_v14 = vsel %vm1781_vm4, %v1582_v60, %v1930_v47  ;;  %v1938_v34 = vpop.permute.xlu1 %1937 }
 0x1dc   : > { %2234 = vst.msk [vmem:[%s3159_s25 + $0x198] sm:$0xff] %vm1814_vm5, %v2000_v14  ;;  %v2004_v44 = vsel %vm1781_vm4, %v3821_v42, %v1938_v34 }
 0x1dd   : > { %2238 = vst.msk [vmem:[%s3159_s25 + $0x1d8] sm:$0xff] %vm1814_vm5, %v2004_v44 }
 0x1e2   : > { %v1942_v59 = vpop.permute.xlu0 %1941 }
 0x1e3   : > { %v2006_v53 = vsel %vm1781_vm4, %v3833_v33, %v1942_v59 }
 0x1e4   : > { %2240 = vst.msk [vmem:[%s3159_s25 + $0x1f8] sm:$0xff] %vm1814_vm5, %v2006_v53 }
 0x1e5 PF: > { %s16_s23 = sadd.s32 1, %s2301_s23   ;;  %s4442_s21 = smov %s2297_s22 }
 0x1e6   : > { %p13_p5 = scmp.ge.s32.totalorder %s16_s23, 4   ;;  %s4443_s22 = smov %s4445_s24 }
 0x1e8   :  { %15 = sbr.rel (!%p13_p5) target bundleno = 2 (0x2), region = 81 }

</bundles_post_ra>
